<compile_context>
chip_gen: v5e
topology: v5e:2x2
jax: 0.10.0
libtpu: 0.0.40
codegen_flags: <defaults>
</compile_context>

<pallas_src>
import math

import jax
import jax.numpy as jnp
from jax import lax
from jax.experimental import pallas as pl
from jax.experimental.pallas import tpu as pltpu

# ---- model config (DecoderLayer(d_model=64, n_heads=2), mlp_ratio=4.0) ----
B, S, D = 2, 8, 64
N_HEADS = 2
HEAD_DIM = D // N_HEADS            # 32
MLP_HIDDEN = int(D * 4.0)          # 256
NORM_EPS = 1e-5
DTYPE = jnp.float32
BS = B * S
NEG_BIG = -1e30                    # additive mask value; exp() underflows to exactly 0.0


def _layernorm(x, gamma, beta, eps):
    # x: (BS, D), gamma/beta: (1, D)
    mean = jnp.mean(x, axis=-1, keepdims=True)
    xc = x - mean
    var = jnp.mean(xc * xc, axis=-1, keepdims=True)
    return xc * lax.rsqrt(var + eps) * gamma + beta


def _gelu_exact(x):
    # exact (erf-based) GELU, matching torch.nn.GELU()
    return 0.5 * x * (1.0 + lax.erf(x * (1.0 / math.sqrt(2.0))))


def decoder_layer_kernel(
    x_ref,                                   # (BS, D)
    bias_ref,                                # (BS, BS) additive attention bias (0 / -1e30)
    ln1_g_ref, ln1_b_ref,                    # (1, D)
    wqkv_ref,                                # (N_HEADS, 3, D, HEAD_DIM); Q slot pre-scaled
    bqkv_ref,                                # (N_HEADS, 3, 1, HEAD_DIM); Q slot pre-scaled
    wo_h_ref,                                # (N_HEADS, HEAD_DIM, D)
    bo_ref,                                  # (1, D)
    ln2_g_ref, ln2_b_ref,                    # (1, D)
    w1_ref, b1_ref, w2_ref, b2_ref,          # MLP
    o_ref,                                   # (BS, D)
):
    x = x_ref[...]                            # both batches, flattened (BS, D)

    # ---------------- self-attention branch (pre-norm) ----------------
    h = _layernorm(x, ln1_g_ref[...], ln1_b_ref[...], NORM_EPS)
    bias = bias_ref[...]                      # precomputed block-diag + causal additive mask

    sa = jnp.broadcast_to(bo_ref[...], (BS, D))    # start accumulator at out-proj bias
    for hd in range(N_HEADS):                      # small static loop over heads
        # Leading-axis indexing only (no lane-offset slicing of a fused QKV output).
        q_h = jnp.dot(h, wqkv_ref[hd, 0], preferred_element_type=jnp.float32) + bqkv_ref[hd, 0]
        k_h = jnp.dot(h, wqkv_ref[hd, 1], preferred_element_type=jnp.float32) + bqkv_ref[hd, 1]
        v_h = jnp.dot(h, wqkv_ref[hd, 2], preferred_element_type=jnp.float32) + bqkv_ref[hd, 2]

        # 1/sqrt(head_dim) already folded into q_h via weight prep.
        s = jnp.dot(q_h, k_h.T, preferred_element_type=jnp.float32) + bias
        s = s - jnp.max(s, axis=-1, keepdims=True)           # diagonal always unmasked -> stable
        p = jnp.exp(s)
        p = p / jnp.sum(p, axis=-1, keepdims=True)            # exact; (BS,1) operand is negligible

        pv = jnp.dot(p, v_h, preferred_element_type=jnp.float32)              # (BS, HEAD_DIM)
        sa = sa + jnp.dot(pv, wo_h_ref[hd], preferred_element_type=jnp.float32)

    x1 = x + sa

    # ---------------- MLP branch (pre-norm) ----------------
    h2 = _layernorm(x1, ln2_g_ref[...], ln2_b_ref[...], NORM_EPS)
    m = jnp.dot(h2, w1_ref[...], preferred_element_type=jnp.float32) + b1_ref[...]
    m = _gelu_exact(m)
    m = jnp.dot(m, w2_ref[...], preferred_element_type=jnp.float32) + b2_ref[...]

    o_ref[...] = (x1 + m).astype(o_ref.dtype)


# ---------------- one-time parameter preparation (NOT in the hot path) ----------------
def prepare_params(p):
    scale = 1.0 / math.sqrt(HEAD_DIM)
    wq = p["wq"] * scale                      # fold attention scale into Q projection
    bq = p["bq"] * scale

    def per_head(w):
        return [w[:, hd * HEAD_DIM:(hd + 1) * HEAD_DIM] for hd in range(N_HEADS)]

    wq_h, wk_h, wv_h = per_head(wq), per_head(p["wk"]), per_head(p["wv"])
    bq_h, bk_h, bv_h = per_head(bq), per_head(p["bk"]), per_head(p["bv"])

    wqkv = jnp.stack([jnp.stack([wq_h[hd], wk_h[hd], wv_h[hd]]) for hd in range(N_HEADS)])
    bqkv = jnp.stack([jnp.stack([bq_h[hd], bk_h[hd], bv_h[hd]]) for hd in range(N_HEADS)])
    wo_h = p["wo"].reshape(N_HEADS, HEAD_DIM, D)           # row-split out-proj per head

    # block-diagonal (same batch) + causal additive mask over the flattened token axis
    rows = jnp.arange(BS)[:, None]
    cols = jnp.arange(BS)[None, :]
    allowed = (rows // S == cols // S) & (cols <= rows)
    attn_bias = jnp.where(allowed, 0.0, NEG_BIG).astype(DTYPE)

    return (
        attn_bias,
        p["ln1_g"], p["ln1_b"],
        wqkv, bqkv, wo_h, p["bo"],
        p["ln2_g"], p["ln2_b"],
        p["w1"], p["b1"], p["w2"], p["b2"],
    )


_VMEM_SPEC = pl.BlockSpec(memory_space=pltpu.MemorySpace.VMEM)


def decoder_layer(x, prepped):
    xf = x.reshape(BS, D)                     # free metadata reshape
    args = (xf,) + tuple(prepped)
    out = pl.pallas_call(
        decoder_layer_kernel,
        out_shape=jax.ShapeDtypeStruct((BS, D), x.dtype),
        in_specs=[_VMEM_SPEC] * len(args),    # no grid: single invocation, fully VMEM-resident
        out_specs=_VMEM_SPEC,
    )(*args)
    return out.reshape(B, S, D)


# ---------------- pure-JAX reference for validation ----------------
def reference(x, p):
    def ln(v, g, b):
        mu = jnp.mean(v, axis=-1, keepdims=True)
        var = jnp.mean((v - mu) ** 2, axis=-1, keepdims=True)
        return (v - mu) / jnp.sqrt(var + NORM_EPS) * g + b

    h = ln(x, p["ln1_g"], p["ln1_b"])
    q = h @ p["wq"] + p["bq"]
    k = h @ p["wk"] + p["bk"]
    v = h @ p["wv"] + p["bv"]
    q = q.reshape(B, S, N_HEADS, HEAD_DIM).transpose(0, 2, 1, 3)
    k = k.reshape(B, S, N_HEADS, HEAD_DIM).transpose(0, 2, 1, 3)
    v = v.reshape(B, S, N_HEADS, HEAD_DIM).transpose(0, 2, 1, 3)
    scores = jnp.einsum("bhqd,bhkd->bhqk", q, k) / math.sqrt(HEAD_DIM)
    mask = jnp.tril(jnp.ones((S, S), bool))
    scores = jnp.where(mask, scores, -jnp.inf)
    attn = jax.nn.softmax(scores, axis=-1)
    o = jnp.einsum("bhqk,bhkd->bhqd", attn, v).transpose(0, 2, 1, 3).reshape(B, S, -1)
    x1 = x + (o @ p["wo"] + p["bo"])
    h2 = ln(x1, p["ln2_g"], p["ln2_b"])
    m = jax.nn.gelu(h2 @ p["w1"] + p["b1"], approximate=False) @ p["w2"] + p["b2"]
    return x1 + m


def make_params(key):
    ks = jax.random.split(key, 16)
    s = 0.05
    return {
        "ln1_g": jnp.ones((1, D), DTYPE),
        "ln1_b": jnp.zeros((1, D), DTYPE),
        "wq": s * jax.random.normal(ks[0], (D, N_HEADS * HEAD_DIM), DTYPE),
        "bq": s * jax.random.normal(ks[1], (1, N_HEADS * HEAD_DIM), DTYPE),
        "wk": s * jax.random.normal(ks[2], (D, N_HEADS * HEAD_DIM), DTYPE),
        "bk": s * jax.random.normal(ks[3], (1, N_HEADS * HEAD_DIM), DTYPE),
        "wv": s * jax.random.normal(ks[4], (D, N_HEADS * HEAD_DIM), DTYPE),
        "bv": s * jax.random.normal(ks[5], (1, N_HEADS * HEAD_DIM), DTYPE),
        "wo": s * jax.random.normal(ks[6], (N_HEADS * HEAD_DIM, D), DTYPE),
        "bo": s * jax.random.normal(ks[7], (1, D), DTYPE),
        "ln2_g": jnp.ones((1, D), DTYPE),
        "ln2_b": jnp.zeros((1, D), DTYPE),
        "w1": s * jax.random.normal(ks[8], (D, MLP_HIDDEN), DTYPE),
        "b1": s * jax.random.normal(ks[9], (1, MLP_HIDDEN), DTYPE),
        "w2": s * jax.random.normal(ks[10], (MLP_HIDDEN, D), DTYPE),
        "b2": s * jax.random.normal(ks[11], (1, D), DTYPE),
    }


if __name__ == "__main__":
    key = jax.random.PRNGKey(0)
    kx, kp = jax.random.split(key)
    x = jax.random.normal(kx, (B, S, D), DTYPE)
    params = make_params(kp)

    prepped = jax.block_until_ready(prepare_params(params))   # one-time prep, off the hot path

    out = jax.block_until_ready(decoder_layer(x, prepped))
    ref = jax.block_until_ready(reference(x, params))

    assert out.shape == (B, S, D)
    # All math is exact f32 (exact softmax reciprocal, erf GELU); only the folded
    # attention scale differs by ~1 ulp from the reference ordering.
    assert jnp.allclose(out, ref, rtol=1e-4, atol=1e-4), (
        f"max abs err {jnp.max(jnp.abs(out - ref))}"
    )
    print("KERNEL_OK")
</pallas_src>

<mosaic_0001>
module attributes {stable_mosaic.version = 11 : i64} {
  func.func @decoder_layer_kernel(%arg0: memref<16x64xf32, #tpu.memory_space<vmem>>, %arg1: memref<16x16xf32, #tpu.memory_space<vmem>>, %arg2: memref<1x64xf32, #tpu.memory_space<vmem>>, %arg3: memref<1x64xf32, #tpu.memory_space<vmem>>, %arg4: memref<2x3x64x32xf32, #tpu.memory_space<vmem>>, %arg5: memref<2x3x1x32xf32, #tpu.memory_space<vmem>>, %arg6: memref<2x32x64xf32, #tpu.memory_space<vmem>>, %arg7: memref<1x64xf32, #tpu.memory_space<vmem>>, %arg8: memref<1x64xf32, #tpu.memory_space<vmem>>, %arg9: memref<1x64xf32, #tpu.memory_space<vmem>>, %arg10: memref<64x256xf32, #tpu.memory_space<vmem>>, %arg11: memref<1x256xf32, #tpu.memory_space<vmem>>, %arg12: memref<256x64xf32, #tpu.memory_space<vmem>>, %arg13: memref<1x64xf32, #tpu.memory_space<vmem>>, %arg14: memref<16x64xf32, #tpu.memory_space<vmem>>) attributes {dimension_semantics = [], scalar_prefetch = 0 : i64, scratch_operands = 0 : i64, tpu.core_type = #tpu.core_type<tc>} {
    %c0 = arith.constant 0 : index
    %c0_0 = arith.constant 0 : index
    %0 = vector.load %arg0[%c0, %c0_0] : memref<16x64xf32, #tpu.memory_space<vmem>>, vector<16x64xf32>
    %c0_1 = arith.constant 0 : index
    %c0_2 = arith.constant 0 : index
    %1 = vector.load %arg2[%c0_1, %c0_2] : memref<1x64xf32, #tpu.memory_space<vmem>>, vector<1x64xf32>
    %c0_3 = arith.constant 0 : index
    %c0_4 = arith.constant 0 : index
    %2 = vector.load %arg3[%c0_3, %c0_4] : memref<1x64xf32, #tpu.memory_space<vmem>>, vector<1x64xf32>
    %cst = arith.constant dense<0.000000e+00> : vector<16xf32>
    %3 = vector.multi_reduction <add>, %0, %cst [1] : vector<16x64xf32> to vector<16xf32>
    %4 = vector.shape_cast %3 : vector<16xf32> to vector<16x1xf32>
    %cst_5 = arith.constant 6.400000e+01 : f32
    %5 = vector.broadcast %cst_5 : f32 to vector<16x1xf32>
    %6 = arith.divf %4, %5 : vector<16x1xf32>
    %7 = vector.broadcast %6 : vector<16x1xf32> to vector<16x64xf32>
    %8 = arith.subf %0, %7 : vector<16x64xf32>
    %9 = arith.mulf %8, %8 : vector<16x64xf32>
    %cst_6 = arith.constant dense<0.000000e+00> : vector<16xf32>
    %10 = vector.multi_reduction <add>, %9, %cst_6 [1] : vector<16x64xf32> to vector<16xf32>
    %11 = vector.shape_cast %10 : vector<16xf32> to vector<16x1xf32>
    %cst_7 = arith.constant 6.400000e+01 : f32
    %12 = vector.broadcast %cst_7 : f32 to vector<16x1xf32>
    %13 = arith.divf %11, %12 : vector<16x1xf32>
    %cst_8 = arith.constant 9.99999974E-6 : f32
    %14 = vector.broadcast %cst_8 : f32 to vector<16x1xf32>
    %15 = arith.addf %13, %14 : vector<16x1xf32>
    %16 = math.rsqrt %15 : vector<16x1xf32>
    %17 = vector.broadcast %16 : vector<16x1xf32> to vector<16x64xf32>
    %18 = arith.mulf %8, %17 : vector<16x64xf32>
    %19 = vector.broadcast %1 : vector<1x64xf32> to vector<16x64xf32>
    %20 = arith.mulf %18, %19 : vector<16x64xf32>
    %21 = vector.broadcast %2 : vector<1x64xf32> to vector<16x64xf32>
    %22 = arith.addf %20, %21 : vector<16x64xf32>
    %c0_9 = arith.constant 0 : index
    %c0_10 = arith.constant 0 : index
    %23 = vector.load %arg1[%c0_9, %c0_10] : memref<16x16xf32, #tpu.memory_space<vmem>>, vector<16x16xf32>
    %c0_11 = arith.constant 0 : index
    %c0_12 = arith.constant 0 : index
    %24 = vector.load %arg7[%c0_11, %c0_12] : memref<1x64xf32, #tpu.memory_space<vmem>>, vector<1x64xf32>
    %25 = vector.shape_cast %24 : vector<1x64xf32> to vector<1x64xf32>
    %26 = vector.broadcast %25 : vector<1x64xf32> to vector<16x64xf32>
    %c0_13 = arith.constant 0 : index
    %c0_14 = arith.constant 0 : index
    %c0_15 = arith.constant 0 : index
    %c0_16 = arith.constant 0 : index
    %27 = vector.load %arg4[%c0_13, %c0_14, %c0_15, %c0_16] : memref<2x3x64x32xf32, #tpu.memory_space<vmem>>, vector<1x1x64x32xf32>
    %28 = vector.shape_cast %27 : vector<1x1x64x32xf32> to vector<64x32xf32>
    %cst_17 = arith.constant dense<0.000000e+00> : vector<16x32xf32>
    %29 = tpu.matmul %22, %28, %cst_17 {dimension_numbers = #tpu.dot_dimension_numbers<[1], [0], [0], [1], [0, 0, 1, 1], [], []>} : vector<16x64xf32>, vector<64x32xf32>, vector<16x32xf32> -> vector<16x32xf32>
    %c0_18 = arith.constant 0 : index
    %c0_19 = arith.constant 0 : index
    %c0_20 = arith.constant 0 : index
    %c0_21 = arith.constant 0 : index
    %30 = vector.load %arg5[%c0_18, %c0_19, %c0_20, %c0_21] : memref<2x3x1x32xf32, #tpu.memory_space<vmem>>, vector<1x1x1x32xf32>
    %31 = vector.shape_cast %30 : vector<1x1x1x32xf32> to vector<1x32xf32>
    %32 = vector.broadcast %31 : vector<1x32xf32> to vector<16x32xf32>
    %33 = arith.addf %29, %32 : vector<16x32xf32>
    %c0_22 = arith.constant 0 : index
    %c1 = arith.constant 1 : index
    %c0_23 = arith.constant 0 : index
    %c0_24 = arith.constant 0 : index
    %34 = vector.load %arg4[%c0_22, %c1, %c0_23, %c0_24] : memref<2x3x64x32xf32, #tpu.memory_space<vmem>>, vector<1x1x64x32xf32>
    %35 = vector.shape_cast %34 : vector<1x1x64x32xf32> to vector<64x32xf32>
    %cst_25 = arith.constant dense<0.000000e+00> : vector<16x32xf32>
    %36 = tpu.matmul %22, %35, %cst_25 {dimension_numbers = #tpu.dot_dimension_numbers<[1], [0], [0], [1], [0, 0, 1, 1], [], []>} : vector<16x64xf32>, vector<64x32xf32>, vector<16x32xf32> -> vector<16x32xf32>
    %c0_26 = arith.constant 0 : index
    %c1_27 = arith.constant 1 : index
    %c0_28 = arith.constant 0 : index
    %c0_29 = arith.constant 0 : index
    %37 = vector.load %arg5[%c0_26, %c1_27, %c0_28, %c0_29] : memref<2x3x1x32xf32, #tpu.memory_space<vmem>>, vector<1x1x1x32xf32>
    %38 = vector.shape_cast %37 : vector<1x1x1x32xf32> to vector<1x32xf32>
    %39 = vector.broadcast %38 : vector<1x32xf32> to vector<16x32xf32>
    %40 = arith.addf %36, %39 : vector<16x32xf32>
    %c0_30 = arith.constant 0 : index
    %c2 = arith.constant 2 : index
    %c0_31 = arith.constant 0 : index
    %c0_32 = arith.constant 0 : index
    %41 = vector.load %arg4[%c0_30, %c2, %c0_31, %c0_32] : memref<2x3x64x32xf32, #tpu.memory_space<vmem>>, vector<1x1x64x32xf32>
    %42 = vector.shape_cast %41 : vector<1x1x64x32xf32> to vector<64x32xf32>
    %cst_33 = arith.constant dense<0.000000e+00> : vector<16x32xf32>
    %43 = tpu.matmul %22, %42, %cst_33 {dimension_numbers = #tpu.dot_dimension_numbers<[1], [0], [0], [1], [0, 0, 1, 1], [], []>} : vector<16x64xf32>, vector<64x32xf32>, vector<16x32xf32> -> vector<16x32xf32>
    %c0_34 = arith.constant 0 : index
    %c2_35 = arith.constant 2 : index
    %c0_36 = arith.constant 0 : index
    %c0_37 = arith.constant 0 : index
    %44 = vector.load %arg5[%c0_34, %c2_35, %c0_36, %c0_37] : memref<2x3x1x32xf32, #tpu.memory_space<vmem>>, vector<1x1x1x32xf32>
    %45 = vector.shape_cast %44 : vector<1x1x1x32xf32> to vector<1x32xf32>
    %46 = vector.broadcast %45 : vector<1x32xf32> to vector<16x32xf32>
    %47 = arith.addf %43, %46 : vector<16x32xf32>
    %48 = tpu.transpose %40, [1, 0] : vector<16x32xf32> -> vector<32x16xf32>
    %cst_38 = arith.constant dense<0.000000e+00> : vector<16x16xf32>
    %49 = tpu.matmul %33, %48, %cst_38 {dimension_numbers = #tpu.dot_dimension_numbers<[1], [0], [0], [1], [0, 0, 1, 1], [], []>} : vector<16x32xf32>, vector<32x16xf32>, vector<16x16xf32> -> vector<16x16xf32>
    %50 = arith.addf %49, %23 : vector<16x16xf32>
    %cst_39 = arith.constant dense<0xFF800000> : vector<16xf32>
    %51 = vector.multi_reduction <maximumf>, %50, %cst_39 [1] : vector<16x16xf32> to vector<16xf32>
    %52 = vector.shape_cast %51 : vector<16xf32> to vector<16x1xf32>
    %53 = vector.broadcast %52 : vector<16x1xf32> to vector<16x16xf32>
    %54 = arith.subf %50, %53 : vector<16x16xf32>
    %55 = math.exp %54 : vector<16x16xf32>
    %cst_40 = arith.constant dense<0.000000e+00> : vector<16xf32>
    %56 = vector.multi_reduction <add>, %55, %cst_40 [1] : vector<16x16xf32> to vector<16xf32>
    %57 = vector.shape_cast %56 : vector<16xf32> to vector<16x1xf32>
    %58 = vector.broadcast %57 : vector<16x1xf32> to vector<16x16xf32>
    %59 = arith.divf %55, %58 : vector<16x16xf32>
    %cst_41 = arith.constant dense<0.000000e+00> : vector<16x32xf32>
    %60 = tpu.matmul %59, %47, %cst_41 {dimension_numbers = #tpu.dot_dimension_numbers<[1], [0], [0], [1], [0, 0, 1, 1], [], []>} : vector<16x16xf32>, vector<16x32xf32>, vector<16x32xf32> -> vector<16x32xf32>
    %c0_42 = arith.constant 0 : index
    %c0_43 = arith.constant 0 : index
    %c0_44 = arith.constant 0 : index
    %61 = vector.load %arg6[%c0_42, %c0_43, %c0_44] : memref<2x32x64xf32, #tpu.memory_space<vmem>>, vector<1x32x64xf32>
    %62 = vector.shape_cast %61 : vector<1x32x64xf32> to vector<32x64xf32>
    %cst_45 = arith.constant dense<0.000000e+00> : vector<16x64xf32>
    %63 = tpu.matmul %60, %62, %cst_45 {dimension_numbers = #tpu.dot_dimension_numbers<[1], [0], [0], [1], [0, 0, 1, 1], [], []>} : vector<16x32xf32>, vector<32x64xf32>, vector<16x64xf32> -> vector<16x64xf32>
    %64 = arith.addf %26, %63 : vector<16x64xf32>
    %c1_46 = arith.constant 1 : index
    %c0_47 = arith.constant 0 : index
    %c0_48 = arith.constant 0 : index
    %c0_49 = arith.constant 0 : index
    %65 = vector.load %arg4[%c1_46, %c0_47, %c0_48, %c0_49] : memref<2x3x64x32xf32, #tpu.memory_space<vmem>>, vector<1x1x64x32xf32>
    %66 = vector.shape_cast %65 : vector<1x1x64x32xf32> to vector<64x32xf32>
    %cst_50 = arith.constant dense<0.000000e+00> : vector<16x32xf32>
    %67 = tpu.matmul %22, %66, %cst_50 {dimension_numbers = #tpu.dot_dimension_numbers<[1], [0], [0], [1], [0, 0, 1, 1], [], []>} : vector<16x64xf32>, vector<64x32xf32>, vector<16x32xf32> -> vector<16x32xf32>
    %c1_51 = arith.constant 1 : index
    %c0_52 = arith.constant 0 : index
    %c0_53 = arith.constant 0 : index
    %c0_54 = arith.constant 0 : index
    %68 = vector.load %arg5[%c1_51, %c0_52, %c0_53, %c0_54] : memref<2x3x1x32xf32, #tpu.memory_space<vmem>>, vector<1x1x1x32xf32>
    %69 = vector.shape_cast %68 : vector<1x1x1x32xf32> to vector<1x32xf32>
    %70 = vector.broadcast %69 : vector<1x32xf32> to vector<16x32xf32>
    %71 = arith.addf %67, %70 : vector<16x32xf32>
    %c1_55 = arith.constant 1 : index
    %c1_56 = arith.constant 1 : index
    %c0_57 = arith.constant 0 : index
    %c0_58 = arith.constant 0 : index
    %72 = vector.load %arg4[%c1_55, %c1_56, %c0_57, %c0_58] : memref<2x3x64x32xf32, #tpu.memory_space<vmem>>, vector<1x1x64x32xf32>
    %73 = vector.shape_cast %72 : vector<1x1x64x32xf32> to vector<64x32xf32>
    %cst_59 = arith.constant dense<0.000000e+00> : vector<16x32xf32>
    %74 = tpu.matmul %22, %73, %cst_59 {dimension_numbers = #tpu.dot_dimension_numbers<[1], [0], [0], [1], [0, 0, 1, 1], [], []>} : vector<16x64xf32>, vector<64x32xf32>, vector<16x32xf32> -> vector<16x32xf32>
    %c1_60 = arith.constant 1 : index
    %c1_61 = arith.constant 1 : index
    %c0_62 = arith.constant 0 : index
    %c0_63 = arith.constant 0 : index
    %75 = vector.load %arg5[%c1_60, %c1_61, %c0_62, %c0_63] : memref<2x3x1x32xf32, #tpu.memory_space<vmem>>, vector<1x1x1x32xf32>
    %76 = vector.shape_cast %75 : vector<1x1x1x32xf32> to vector<1x32xf32>
    %77 = vector.broadcast %76 : vector<1x32xf32> to vector<16x32xf32>
    %78 = arith.addf %74, %77 : vector<16x32xf32>
    %c1_64 = arith.constant 1 : index
    %c2_65 = arith.constant 2 : index
    %c0_66 = arith.constant 0 : index
    %c0_67 = arith.constant 0 : index
    %79 = vector.load %arg4[%c1_64, %c2_65, %c0_66, %c0_67] : memref<2x3x64x32xf32, #tpu.memory_space<vmem>>, vector<1x1x64x32xf32>
    %80 = vector.shape_cast %79 : vector<1x1x64x32xf32> to vector<64x32xf32>
    %cst_68 = arith.constant dense<0.000000e+00> : vector<16x32xf32>
    %81 = tpu.matmul %22, %80, %cst_68 {dimension_numbers = #tpu.dot_dimension_numbers<[1], [0], [0], [1], [0, 0, 1, 1], [], []>} : vector<16x64xf32>, vector<64x32xf32>, vector<16x32xf32> -> vector<16x32xf32>
    %c1_69 = arith.constant 1 : index
    %c2_70 = arith.constant 2 : index
    %c0_71 = arith.constant 0 : index
    %c0_72 = arith.constant 0 : index
    %82 = vector.load %arg5[%c1_69, %c2_70, %c0_71, %c0_72] : memref<2x3x1x32xf32, #tpu.memory_space<vmem>>, vector<1x1x1x32xf32>
    %83 = vector.shape_cast %82 : vector<1x1x1x32xf32> to vector<1x32xf32>
    %84 = vector.broadcast %83 : vector<1x32xf32> to vector<16x32xf32>
    %85 = arith.addf %81, %84 : vector<16x32xf32>
    %86 = tpu.transpose %78, [1, 0] : vector<16x32xf32> -> vector<32x16xf32>
    %cst_73 = arith.constant dense<0.000000e+00> : vector<16x16xf32>
    %87 = tpu.matmul %71, %86, %cst_73 {dimension_numbers = #tpu.dot_dimension_numbers<[1], [0], [0], [1], [0, 0, 1, 1], [], []>} : vector<16x32xf32>, vector<32x16xf32>, vector<16x16xf32> -> vector<16x16xf32>
    %88 = arith.addf %87, %23 : vector<16x16xf32>
    %cst_74 = arith.constant dense<0xFF800000> : vector<16xf32>
    %89 = vector.multi_reduction <maximumf>, %88, %cst_74 [1] : vector<16x16xf32> to vector<16xf32>
    %90 = vector.shape_cast %89 : vector<16xf32> to vector<16x1xf32>
    %91 = vector.broadcast %90 : vector<16x1xf32> to vector<16x16xf32>
    %92 = arith.subf %88, %91 : vector<16x16xf32>
    %93 = math.exp %92 : vector<16x16xf32>
    %cst_75 = arith.constant dense<0.000000e+00> : vector<16xf32>
    %94 = vector.multi_reduction <add>, %93, %cst_75 [1] : vector<16x16xf32> to vector<16xf32>
    %95 = vector.shape_cast %94 : vector<16xf32> to vector<16x1xf32>
    %96 = vector.broadcast %95 : vector<16x1xf32> to vector<16x16xf32>
    %97 = arith.divf %93, %96 : vector<16x16xf32>
    %cst_76 = arith.constant dense<0.000000e+00> : vector<16x32xf32>
    %98 = tpu.matmul %97, %85, %cst_76 {dimension_numbers = #tpu.dot_dimension_numbers<[1], [0], [0], [1], [0, 0, 1, 1], [], []>} : vector<16x16xf32>, vector<16x32xf32>, vector<16x32xf32> -> vector<16x32xf32>
    %c1_77 = arith.constant 1 : index
    %c0_78 = arith.constant 0 : index
    %c0_79 = arith.constant 0 : index
    %99 = vector.load %arg6[%c1_77, %c0_78, %c0_79] : memref<2x32x64xf32, #tpu.memory_space<vmem>>, vector<1x32x64xf32>
    %100 = vector.shape_cast %99 : vector<1x32x64xf32> to vector<32x64xf32>
    %cst_80 = arith.constant dense<0.000000e+00> : vector<16x64xf32>
    %101 = tpu.matmul %98, %100, %cst_80 {dimension_numbers = #tpu.dot_dimension_numbers<[1], [0], [0], [1], [0, 0, 1, 1], [], []>} : vector<16x32xf32>, vector<32x64xf32>, vector<16x64xf32> -> vector<16x64xf32>
    %102 = arith.addf %64, %101 : vector<16x64xf32>
    %103 = arith.addf %0, %102 : vector<16x64xf32>
    %c0_81 = arith.constant 0 : index
    %c0_82 = arith.constant 0 : index
    %104 = vector.load %arg8[%c0_81, %c0_82] : memref<1x64xf32, #tpu.memory_space<vmem>>, vector<1x64xf32>
    %c0_83 = arith.constant 0 : index
    %c0_84 = arith.constant 0 : index
    %105 = vector.load %arg9[%c0_83, %c0_84] : memref<1x64xf32, #tpu.memory_space<vmem>>, vector<1x64xf32>
    %cst_85 = arith.constant dense<0.000000e+00> : vector<16xf32>
    %106 = vector.multi_reduction <add>, %103, %cst_85 [1] : vector<16x64xf32> to vector<16xf32>
    %107 = vector.shape_cast %106 : vector<16xf32> to vector<16x1xf32>
    %cst_86 = arith.constant 6.400000e+01 : f32
    %108 = vector.broadcast %cst_86 : f32 to vector<16x1xf32>
    %109 = arith.divf %107, %108 : vector<16x1xf32>
    %110 = vector.broadcast %109 : vector<16x1xf32> to vector<16x64xf32>
    %111 = arith.subf %103, %110 : vector<16x64xf32>
    %112 = arith.mulf %111, %111 : vector<16x64xf32>
    %cst_87 = arith.constant dense<0.000000e+00> : vector<16xf32>
    %113 = vector.multi_reduction <add>, %112, %cst_87 [1] : vector<16x64xf32> to vector<16xf32>
    %114 = vector.shape_cast %113 : vector<16xf32> to vector<16x1xf32>
    %cst_88 = arith.constant 6.400000e+01 : f32
    %115 = vector.broadcast %cst_88 : f32 to vector<16x1xf32>
    %116 = arith.divf %114, %115 : vector<16x1xf32>
    %cst_89 = arith.constant 9.99999974E-6 : f32
    %117 = vector.broadcast %cst_89 : f32 to vector<16x1xf32>
    %118 = arith.addf %116, %117 : vector<16x1xf32>
    %119 = math.rsqrt %118 : vector<16x1xf32>
    %120 = vector.broadcast %119 : vector<16x1xf32> to vector<16x64xf32>
    %121 = arith.mulf %111, %120 : vector<16x64xf32>
    %122 = vector.broadcast %104 : vector<1x64xf32> to vector<16x64xf32>
    %123 = arith.mulf %121, %122 : vector<16x64xf32>
    %124 = vector.broadcast %105 : vector<1x64xf32> to vector<16x64xf32>
    %125 = arith.addf %123, %124 : vector<16x64xf32>
    %c0_90 = arith.constant 0 : index
    %c0_91 = arith.constant 0 : index
    %126 = vector.load %arg10[%c0_90, %c0_91] : memref<64x256xf32, #tpu.memory_space<vmem>>, vector<64x256xf32>
    %cst_92 = arith.constant dense<0.000000e+00> : vector<16x256xf32>
    %127 = tpu.matmul %125, %126, %cst_92 {dimension_numbers = #tpu.dot_dimension_numbers<[1], [0], [0], [1], [0, 0, 1, 1], [], []>} : vector<16x64xf32>, vector<64x256xf32>, vector<16x256xf32> -> vector<16x256xf32>
    %c0_93 = arith.constant 0 : index
    %c0_94 = arith.constant 0 : index
    %128 = vector.load %arg11[%c0_93, %c0_94] : memref<1x256xf32, #tpu.memory_space<vmem>>, vector<1x256xf32>
    %129 = vector.broadcast %128 : vector<1x256xf32> to vector<16x256xf32>
    %130 = arith.addf %127, %129 : vector<16x256xf32>
    %cst_95 = arith.constant 5.000000e-01 : f32
    %131 = vector.broadcast %cst_95 : f32 to vector<16x256xf32>
    %132 = arith.mulf %131, %130 : vector<16x256xf32>
    %cst_96 = arith.constant 0.707106769 : f32
    %133 = vector.broadcast %cst_96 : f32 to vector<16x256xf32>
    %134 = arith.mulf %130, %133 : vector<16x256xf32>
    %135 = math.erf %134 : vector<16x256xf32>
    %cst_97 = arith.constant 1.000000e+00 : f32
    %136 = vector.broadcast %cst_97 : f32 to vector<16x256xf32>
    %137 = arith.addf %136, %135 : vector<16x256xf32>
    %138 = arith.mulf %132, %137 : vector<16x256xf32>
    %c0_98 = arith.constant 0 : index
    %c0_99 = arith.constant 0 : index
    %139 = vector.load %arg12[%c0_98, %c0_99] : memref<256x64xf32, #tpu.memory_space<vmem>>, vector<256x64xf32>
    %cst_100 = arith.constant dense<0.000000e+00> : vector<16x64xf32>
    %140 = tpu.matmul %138, %139, %cst_100 {dimension_numbers = #tpu.dot_dimension_numbers<[1], [0], [0], [1], [0, 0, 1, 1], [], []>} : vector<16x256xf32>, vector<256x64xf32>, vector<16x64xf32> -> vector<16x64xf32>
    %c0_101 = arith.constant 0 : index
    %c0_102 = arith.constant 0 : index
    %141 = vector.load %arg13[%c0_101, %c0_102] : memref<1x64xf32, #tpu.memory_space<vmem>>, vector<1x64xf32>
    %142 = vector.broadcast %141 : vector<1x64xf32> to vector<16x64xf32>
    %143 = arith.addf %140, %142 : vector<16x64xf32>
    %144 = arith.addf %103, %143 : vector<16x64xf32>
    %c0_103 = arith.constant 0 : index
    %c0_104 = arith.constant 0 : index
    %145 = vector.load %arg14[%c0_103, %c0_104] : memref<16x64xf32, #tpu.memory_space<vmem>>, vector<16x64xf32>
    tpu.vector_store %arg14[%c0_103, %c0_104], %144 {strides = array<i32>} : memref<16x64xf32, #tpu.memory_space<vmem>>, vector<16x64xf32>,
    return
  }
}

</mosaic_0001>

<bundles_post_ra>
// kernel: tpu_custom_call.1
= control target key start
LH: loop header
LB: loop body
LE: loop exit
PB: predicated region body
PF: predicated region fallthrough
CT: control target
= control target key end

     0   :  { %vm52_vm0 = vcmask 523264   ;;  %s1926_s0 = inlined_call_operand.vmem [shape: f32[16,64], index: 0, kind: input, shape index: {}]   ;;  %s1927_s1 = inlined_call_operand.vmem [shape: f32[16,16], index: 1, kind: input, shape index: {}]   ;;  %s1928_s2 = inlined_call_operand.vmem [shape: f32[1,64], index: 2, kind: input, shape index: {}]   ;;  %s1929_s3 = inlined_call_operand.vmem [shape: f32[1,64], index: 3, kind: input, shape index: {}]   ;;  %s1930_s4 = inlined_call_operand.vmem [shape: f32[2,3,64,32], index: 4, kind: input, shape index: {}]   ;;  %s1931_s5 = inlined_call_operand.vmem [shape: f32[2,3,1,32], index: 5, kind: input, shape index: {}]   ;;  %s1932_s6 = inlined_call_operand.vmem [shape: f32[2,32,64], index: 6, kind: input, shape index: {}]   ;;  %s1933_s7 = inlined_call_operand.vmem [shape: f32[1,64], index: 7, kind: input, shape index: {}]   ;;  %s1934_s8 = inlined_call_operand.vmem [shape: f32[1,64], index: 8, kind: input, shape index: {}]   ;;  %s1935_s9 = inlined_call_operand.vmem [shape: f32[1,64], index: 9, kind: input, shape index: {}]   ;;  %s1936_s10 = inlined_call_operand.vmem [shape: f32[64,256], index: 10, kind: input, shape index: {}]   ;;  %s1937_s11 = inlined_call_operand.vmem [shape: f32[1,256], index: 11, kind: input, shape index: {}]   ;;  %s1938_s12 = inlined_call_operand.vmem [shape: f32[256,64], index: 12, kind: input, shape index: {}]   ;;  %s1939_s13 = inlined_call_operand.vmem [shape: f32[1,64], index: 13, kind: input, shape index: {}]   ;;  %s1940_s14 = inlined_call_operand.hbm [shape: f32[16,64], index: 14, kind: output, shape index: {}]  }
   0x1   :  { %v1306_v0 = vld [vmem:[%s1926_s0] sm:$0xff]  ;;  %v1313_v2 = vld [vmem:[%s1926_s0 + $0x8] sm:$0xff] }
   0x2   :  { %v53_v1 = vsel %vm52_vm0, %v1306_v0, 0.0 }
   0x3   :  { %54 = vadd.xlane.f32.xlu0 %v53_v1 }
   0x4   :  { %19 = vsyncpa [#allocation3], 0  ;;  %v56_v3 = vsel %vm52_vm0, %v1313_v2, 0.0  ;;  %v1224_v4 = vmov 64.0   ;;  %v127_v21 = vld [vmem:[%s1930_s4 + $0x38] sm:$0xff]  ;;  %v126_v24 = vld [vmem:[%s1930_s4 + $0x30] sm:$0xff] }
   0x5   :  { %1164 = vrcp.f32 %v1224_v4  ;;  %v1064_v22 = vld [vmem:[%s1930_s4 + $0x78] sm:$0xff]  ;;  %146 = vmatpush.msra.mxu0 %v127_v21  ;;  %v1063_v25 = vld [vmem:[%s1930_s4 + $0x70] sm:$0xff]  ;;  %v125_v27 = vld [vmem:[%s1930_s4 + $0x28] sm:$0xff]  ;;  %vm235_vm8 = vcmask 261120   ;;  %vm271_vm9 = vcmask 130048   ;;  %s1043_s17 = sshll.u32 %s1940_s14, 4  ;;  %s1044_s17 = int_to_ptr.hbm [resolvable:$true] %s1043_s17 }
   0x6   :  { %v1075_v23 = vld [vmem:[%s1930_s4 + $0xb8] sm:$0xff]  ;;  %183 = vmatpush.msra.mxu1 %v1064_v22  ;;  %v1074_v26 = vld [vmem:[%s1930_s4 + $0xb0] sm:$0xff]  ;;  %v1062_v28 = vld [vmem:[%s1930_s4 + $0x68] sm:$0xff] }
   0x7   :  { %220 = vmatpush.msra.mxu2 %v1075_v23  ;;  %147 = vmatpush.msra.mxu0 %v126_v24  ;;  %v1073_v29 = vld [vmem:[%s1930_s4 + $0xa8] sm:$0xff]  ;;  %v124_v30 = vld [vmem:[%s1930_s4 + $0x20] sm:$0xff]  ;;  %v123_v33 = vld [vmem:[%s1930_s4 + $0x18] sm:$0xff] }
   0x8   :  { %184 = vmatpush.msra.mxu1 %v1063_v25  ;;  %v1061_v31 = vld [vmem:[%s1930_s4 + $0x60] sm:$0xff]  ;;  %v1060_v34 = vld [vmem:[%s1930_s4 + $0x58] sm:$0xff]  ;;  %v122_v36 = vld [vmem:[%s1930_s4 + $0x10] sm:$0xff] }
   0x9   :  { %221 = vmatpush.msra.mxu2 %v1074_v26  ;;  %148 = vmatpush.msra.mxu0 %v125_v27  ;;  %v1072_v32 = vld [vmem:[%s1930_s4 + $0xa0] sm:$0xff]  ;;  %v1071_v35 = vld [vmem:[%s1930_s4 + $0x98] sm:$0xff]  ;;  %v1059_v37 = vld [vmem:[%s1930_s4 + $0x50] sm:$0xff] }
   0xa   :  { %185 = vmatpush.msra.mxu1 %v1062_v28  ;;  %v1070_v38 = vld [vmem:[%s1930_s4 + $0x90] sm:$0xff]  ;;  %v121_v39 = vld [vmem:[%s1930_s4 + $0x8] sm:$0xff]  ;;  %v120_v42 = vld [vmem:[%s1930_s4] sm:$0xff] }
   0xb   :  { %57 = vadd.xlane.f32.xlu0 %v56_v3  ;;  %v1165_v5 = vpop.eup %1164  ;;  %222 = vmatpush.msra.mxu2 %v1073_v29  ;;  %v1058_v40 = vld [vmem:[%s1930_s4 + $0x48] sm:$0xff]  ;;  %v1057_v43 = vld [vmem:[%s1930_s4 + $0x40] sm:$0xff]  ;;  %v1408_v45 = vld [vmem:[%s1930_s4 + $0x138] sm:$0xff] }
   0xc   :  { %v60_v6 = vmul.f32 64.0, %v1165_v5  ;;  %vm64_vm1 = vweird.f32 %v1165_v5  ;;  %149 = vmatpush.msra.mxu0 %v124_v30  ;;  %186 = vmatpush.msra.mxu1 %v1061_v31  ;;  %v1069_v41 = vld [vmem:[%s1930_s4 + $0x88] sm:$0xff]  ;;  %v1068_v44 = vld [vmem:[%s1930_s4 + $0x80] sm:$0xff]  ;;  %v1414_v47 = vld [vmem:[%s1930_s4 + $0x130] sm:$0xff] }
   0xd   :  { %223 = vmatpush.msra.mxu2 %v1072_v32  ;;  %v1421_v49 = vld [vmem:[%s1930_s4 + $0x128] sm:$0xff]  ;;  %v1427_v51 = vld [vmem:[%s1930_s4 + $0x120] sm:$0xff]  ;;  %v1433_v52 = vld [vmem:[%s1930_s4 + $0x118] sm:$0xff] }
   0xe   :  { %v61_v7 = vsub.f32 1.0, %v60_v6  ;;  %150 = vmatpush.msra.mxu0 %v123_v33  ;;  %187 = vmatpush.msra.mxu1 %v1060_v34  ;;  %v1438_v53 = vld [vmem:[%s1930_s4 + $0x110] sm:$0xff]  ;;  %v1444_v55 = vld [vmem:[%s1930_s4 + $0x108] sm:$0xff]  ;;  %v1451_v57 = vld [vmem:[%s1930_s4 + $0x100] sm:$0xff] }
   0xf   :  { %224 = vmatpush.msra.mxu2 %v1071_v35  ;;  %v1154_v26 = vld [vmem:[%s1931_s5] ss:$0 sm:$0xff]  ;;  %v1156_v28 = vld [vmem:[%s1931_s5 + $0x2] ss:$0 sm:$0xff] }
  0x10   :  { %v62_v8 = vmul.f32 %v1165_v5, %v61_v7  ;;  %151 = vmatpush.msra.mxu0 %v122_v36  ;;  %188 = vmatpush.msra.mxu1 %v1059_v37  ;;  %v1497_v35 = vld [vmem:[%s1927_s1] sm:$0xff] }
  0x11   :  { %225 = vmatpush.msra.mxu2 %v1070_v38 }
  0x12   :  { %v63_v9 = vadd.f32 %v1165_v5, %v62_v8  ;;  %152 = vmatpush.msra.mxu0 %v121_v39  ;;  %189 = vmatpush.msra.mxu1 %v1058_v40  ;;  %v1153_v8 = vld [vmem:[%s1929_s3] ss:$0 sm:$0xff]  ;;  %v1504_v39 = vld [vmem:[%s1927_s1 + $0x8] sm:$0xff] }
  0x13   :  { %226 = vmatpush.msra.mxu2 %v1069_v41 }
  0x14   :  { %v1317_v10 = vsel %vm64_vm1, %v1165_v5, %v63_v9  ;;  %153 = vmatpush.msra.mxu0 %v120_v42  ;;  %190 = vmatpush.msra.mxu1 %v1057_v43  ;;  %v1152_v5 = vld [vmem:[%s1928_s2] ss:$0 sm:$0xff] }
  0x15   :  { %227 = vmatpush.msra.mxu2 %v1068_v44 }
  0x17   :  { %1140 = vmatpush.msrb.mxu2 %v1408_v45 }
  0x19   :  { %1141 = vmatpush.msrb.mxu2 %v1414_v47 }
  0x1b   :  { %1142 = vmatpush.msrb.mxu2 %v1421_v49 }
  0x1d   :  { %1143 = vmatpush.msrb.mxu2 %v1427_v51 }
  0x1f   :  { %1144 = vmatpush.msrb.mxu2 %v1433_v52 }
  0x21   :  { %1145 = vmatpush.msrb.mxu2 %v1438_v53 }
  0x23   :  { %1146 = vmatpush.msrb.mxu2 %v1444_v55 }
  0x25   :  { %1147 = vmatpush.msrb.mxu2 %v1451_v57 }
  0x76   :  { %v55_v11 = vpop.xlane.xlu0 %54 }
  0x77   :  { %v66_v12 = vmul.f32 %v1317_v10, %v55_v11 }
  0x79   :  { %v1321_v13 = vsub.f32 %v1306_v0, %v66_v12 }
  0x7b   :  { %v70_v14 = vmul.f32 %v1321_v13, %v1321_v13 }
  0x7d   :  { %v72_v15 = vsel %vm52_vm0, %v70_v14, 0.0 }
  0x7e   :  { %73 = vadd.xlane.f32.xlu1 %v72_v15  ;;  %v58_v16 = vpop.xlane.xlu0 %57 }
  0x7f   :  { %v67_v17 = vmul.f32 %v1317_v10, %v58_v16 }
  0x81   :  { %v1328_v18 = vsub.f32 %v1313_v2, %v67_v17 }
  0x83   :  { %v71_v19 = vmul.f32 %v1328_v18, %v1328_v18 }
  0x85   :  { %v75_v20 = vsel %vm52_vm0, %v71_v19, 0.0 }
  0x86   :  { %76 = vadd.xlane.f32.xlu1 %v75_v20 }
  0xf1   :  { %v74_v46 = vpop.xlane.xlu1 %73 }
  0xf2   :  { %v78_v48 = vmul.f32 %v74_v46, %v1317_v10 }
  0xf4   :  { %v80_v50 = vadd.f32 1e-05, %v78_v48 }
  0xf6   :  { %1166 = vrsqrt.f32 %v80_v50  ;;  %vm88_vm3 = vweird.f32 %v80_v50 }
  0xf9   :  { %v77_v54 = vpop.xlane.xlu1 %76 }
  0xfa   :  { %v79_v56 = vmul.f32 %v77_v54, %v1317_v10 }
  0xfc   :  { %v1167_v58 = vpop.eup %1166  ;;  %v81_v59 = vadd.f32 1e-05, %v79_v56 }
  0xfd   :  { %v83_v60 = vmul.f32 %v1167_v58, %v80_v50  ;;  %vm89_vm2 = vweird.f32 %v1167_v58 }
  0xfe   :  { %1168 = vrsqrt.f32 %v81_v59  ;;  %vm90_vm4 = vmor %vm88_vm3, %vm89_vm2  ;;  %vm98_vm6 = vweird.f32 %v81_v59 }
  0xff   :  { %v84_v61 = vmul.f32 %v1167_v58, %v83_v60 }
 0x101   :  { %v85_v62 = vmul.f32 0.5, %v84_v61  ;;  %v1094_v61 = vld [vmem:[%s1930_s4 + $0xf8] sm:$0xff] }
 0x103   :  { %v86_v63 = vsub.f32 1.5, %v85_v62  ;;  %v1093_v62 = vld [vmem:[%s1930_s4 + $0xf0] sm:$0xff] }
 0x104   :  { %v1169_v1 = vpop.eup %1168 }
 0x105   :  { %v87_v3 = vmul.f32 %v1167_v58, %v86_v63  ;;  %v93_v4 = vmul.f32 %v1169_v1, %v81_v59  ;;  %vm99_vm5 = vweird.f32 %v1169_v1  ;;  %v1092_v63 = vld [vmem:[%s1930_s4 + $0xe8] sm:$0xff] }
 0x106   :  { %vm100_vm7 = vmor %vm98_vm6, %vm99_vm5 }
 0x107   :  { %v91_v6 = vsel %vm90_vm4, %v1167_v58, %v87_v3  ;;  %v94_v7 = vmul.f32 %v1169_v1, %v93_v4  ;;  %v1090_v3 = vld [vmem:[%s1930_s4 + $0xd8] sm:$0xff]  ;;  %v1089_v4 = vld [vmem:[%s1930_s4 + $0xd0] sm:$0xff] }
 0x108   :  { %v102_v9 = vmul.f32 %v91_v6, %v1321_v13 }
 0x109   :  { %v95_v11 = vmul.f32 0.5, %v94_v7  ;;  %v1087_v7 = vld [vmem:[%s1930_s4 + $0xc0] sm:$0xff] }
 0x10a   :  { %v107_v12 = vmul.f32 %v1152_v5, %v102_v9 }
 0x10b   :  { %v96_v14 = vsub.f32 1.5, %v95_v11 }
 0x10c   :  { %v1462_v15 = vadd.f32 %v1153_v8, %v107_v12 }
 0x10d   :  { %v97_v16 = vmul.f32 %v1169_v1, %v96_v14 }
 0x10e   :  { %1055 = vmatmul.msk.f32.vlgmr.msra.gmra.mxu0 %vm52_vm0, %v1462_v15  ;;  %1066 = vmatmul.msk.f32.vlgmr.msra.gmra.mxu1 %vm52_vm0, %v1462_v15 }
 0x10f   :  { %v101_v17 = vsel %vm100_vm7, %v1169_v1, %v97_v16  ;;  %1077 = vmatmul.msk.f32.vlgmr.msra.gmra.mxu2 %vm52_vm0, %v1462_v15  ;;  %v1091_v1 = vld [vmem:[%s1930_s4 + $0xe0] sm:$0xff] }
 0x110   :  { %v103_v13 = vmul.f32 %v101_v17, %v1328_v18  ;;  %v1155_v18 = vld [vmem:[%s1931_s5 + $0x1] ss:$0 sm:$0xff] }
 0x112   :  { %v108_v19 = vmul.f32 %v1152_v5, %v103_v13  ;;  %v1088_v5 = vld [vmem:[%s1930_s4 + $0xc8] sm:$0xff] }
 0x114   :  { %v1471_v20 = vadd.f32 %v1153_v8, %v108_v19 }
 0x116   :  { %1056 = vmatmul.msk.f32.gmra.mxu0 %vm52_vm0, %v1471_v20  ;;  %1067 = vmatmul.msk.f32.gmra.mxu1 %vm52_vm0, %v1471_v20 }
 0x117   :  { %1078 = vmatmul.msk.f32.gmra.mxu2 %vm52_vm0, %v1471_v20 }
 0x11f   :  { %1108 = vmatmul.msk.f32.vlgmr.msrb.gmra.mxu2 %vm52_vm0, %v1471_v20 }
 0x18b   :  { %v192_v21 = vpop.f32.mrf.mxu1  ;;  %v155_v25 = vpop.f32.mrf.mxu0 }
 0x18c   :  { %v193_v27 = vadd.f32 %v1155_v18, %v192_v21  ;;  %v156_v31 = vadd.f32 %v1154_v26, %v155_v25 }
 0x192   :  { %v229_v22 = vpop.f32.mrf.mxu2 }
 0x193   :  { %v195_v23 = vpop.f32.mrf.mxu1  ;;  %v230_v32 = vadd.f32 %v1156_v28, %v229_v22  ;;  %v158_v33 = vpop.f32.mrf.mxu0 }
 0x194   :  { %v196_v24 = vadd.f32 %v1155_v18, %v195_v23  ;;  %v159_v34 = vadd.f32 %v1154_v26, %v158_v33  ;;  %v1116_v26 = vld [vmem:[%s1930_s4 + $0x178] sm:$0xff] }
 0x196   :  { %1079 = vmatpush.xpose.msk.msra.mxu3 %vm235_vm8, %v196_v24 }
 0x19a   :  { %v232_v29 = vpop.f32.mrf.mxu2  ;;  %1080 = vmatpush.xpose.msk.msra.mxu3 %vm235_vm8, %v193_v27 }
 0x19b   :  { %v233_v30 = vadd.f32 %v1156_v28, %v232_v29 }
 0x19d   :  { %1081 = vmatmul.msk.f32.vlgmr.msra.gmra.mxu3 %vm235_vm8, %v156_v31 }
 0x19e   :  { %340 = vmatpush.msrb.mxu3 %v233_v30  ;;  %v1115_v30 = vld [vmem:[%s1930_s4 + $0x170] sm:$0xff] }
 0x1a0   :  { %341 = vmatpush.msrb.mxu3 %v230_v32  ;;  %v1114_v32 = vld [vmem:[%s1930_s4 + $0x168] sm:$0xff] }
 0x1a2   :  { %406 = vmatpush.msra.mxu3 %v1094_v61  ;;  %v1158_v61 = vld [vmem:[%s1931_s5 + $0x3] ss:$0 sm:$0xff] }
 0x1a4   :  { %407 = vmatpush.msra.mxu3 %v1093_v62 }
 0x1a5   :  { %1082 = vmatmul.msk.f32.gmra.mxu3 %vm235_vm8, %v159_v34 }
 0x1a6   :  { %408 = vmatpush.msra.mxu3 %v1092_v63 }
 0x1a8   :  { %409 = vmatpush.msra.mxu3 %v1091_v1 }
 0x1aa   :  { %410 = vmatpush.msra.mxu3 %v1090_v3 }
 0x1ac   :  { %411 = vmatpush.msra.mxu3 %v1089_v4 }
 0x1ae   :  { %412 = vmatpush.msra.mxu3 %v1088_v5 }
 0x1b0   :  { %413 = vmatpush.msra.mxu3 %v1087_v7 }
 0x220   :  { %v265_v36 = vpop.f32.mrf.mxu3 }
 0x221   :  { %v266_v37 = vadd.f32 %v265_v36, %v1497_v35  ;;  %v1113_v36 = vld [vmem:[%s1930_s4 + $0x160] sm:$0xff] }
 0x223   :  { %v272_v38 = vsel %vm271_vm9, %v266_v37, -inf }
 0x224   :  { %273 = vmax.xlane.f32.xlu2 %v272_v38 }
 0x228   :  { %v268_v40 = vpop.f32.mrf.mxu3 }
 0x229   :  { %v269_v41 = vadd.f32 %v268_v40, %v1504_v39  ;;  %v1112_v40 = vld [vmem:[%s1930_s4 + $0x158] sm:$0xff] }
 0x22b   :  { %v275_v42 = vsel %vm271_vm9, %v269_v41, -inf }
 0x22c   :  { %276 = vmax.xlane.f32.xlu2 %v275_v42  ;;  %v352_v42 = vld [vmem:[%s1932_s6 + $0x18] sm:$0xff] }
 0x22d   :  { %371 = vmatpush.msrb.mxu0 %v352_v42 }
 0x297   :  { %v274_v43 = vpop.xlane.xlu2 %273 }
 0x298   :  { %v278_v44 = vsub.f32 %v266_v37, %v274_v43  ;;  %v351_v43 = vld [vmem:[%s1932_s6 + $0x10] sm:$0xff] }
 0x299   :  { %372 = vmatpush.msrb.mxu0 %v351_v43 }
 0x29a   :  { %v280_v46 = vmul.f32 1.442695, %v278_v44  ;;  %v1110_v44 = vld [vmem:[%s1930_s4 + $0x148] sm:$0xff] }
 0x29c   :  { %1170 = vpow2.f32 %v280_v46  ;;  %v350_v46 = vld [vmem:[%s1932_s6 + $0x8] sm:$0xff] }
 0x29d   :  { %373 = vmatpush.msrb.mxu0 %v350_v46 }
 0x29f   :  { %v277_v48 = vpop.xlane.xlu2 %276 }
 0x2a0   :  { %v279_v50 = vsub.f32 %v269_v41, %v277_v48  ;;  %v1111_v41 = vld [vmem:[%s1930_s4 + $0x150] sm:$0xff]  ;;  %v1109_v48 = vld [vmem:[%s1930_s4 + $0x140] sm:$0xff] }
 0x2a2   :  { %v1171_v54 = vpop.eup %1170  ;;  %v282_v56 = vmul.f32 1.442695, %v279_v50  ;;  %v349_v50 = vld [vmem:[%s1932_s6] sm:$0xff] }
 0x2a3   :  { %v284_v58 = vsel %vm271_vm9, %v1171_v54, 0.0  ;;  %374 = vmatpush.msrb.mxu0 %v349_v50 }
 0x2a4   :  { %1172 = vpow2.f32 %v282_v56  ;;  %285 = vadd.xlane.f32.xlu0 %v284_v58 }
 0x2a5   :  { %443 = vmatpush.msra.mxu0 %v1408_v45  ;;  %v1157_v45 = vld [vmem:[%s1931_s5 + $0x4] ss:$0 sm:$0xff] }
 0x2a7   :  { %444 = vmatpush.msra.mxu0 %v1414_v47  ;;  %v455_v47 = vpop.f32.mrf.mxu2 }
 0x2a9   :  { %445 = vmatpush.msra.mxu0 %v1421_v49  ;;  %v456_v49 = vadd.f32 %v1157_v45, %v455_v47  ;;  %v1126_v47 = vld [vmem:[%s1932_s6 + $0x20] sm:$0xff] }
 0x2aa   :  { %v1173_v59 = vpop.eup %1172 }
 0x2ab   :  { %v287_v60 = vsel %vm271_vm9, %v1173_v59, 0.0  ;;  %446 = vmatpush.msra.mxu0 %v1427_v51 }
 0x2ac   :  { %288 = vadd.xlane.f32.xlu1 %v287_v60 }
 0x2ad   :  { %447 = vmatpush.msra.mxu0 %v1433_v52 }
 0x2af   :  { %448 = vmatpush.msra.mxu0 %v1438_v53 }
 0x2b1   :  { %449 = vmatpush.msra.mxu0 %v1444_v55 }
 0x2b3   :  { %450 = vmatpush.msra.mxu0 %v1451_v57 }
 0x317   :  { %v286_v6 = vpop.xlane.xlu0 %285 }
 0x318   :  { %1174 = vrcp.f32 %v286_v6  ;;  %v301_v14 = vand.u32 2147483648, %v286_v6  ;;  %v299_v17 = vand.u32 2147483647, %v286_v6  ;;  %vm295_vm11 = vweird.f32 %v286_v6 }
 0x31a   :  { %v302_v21 = vor.u32 1.1754944e-38, %v301_v14  ;;  %vm300_vm13 = vcmp.eq.f32.partialorder %v299_v17, 8.507059e+37 }
 0x31e   :  { %v1175_v8 = vpop.eup %1174 }
 0x31f   :  { %v291_v9 = vmul.f32 %v1175_v8, %v286_v6  ;;  %v289_v11 = vpop.xlane.xlu1 %288  ;;  %vm296_vm10 = vweird.f32 %v1175_v8 }
 0x320   :  { %1176 = vrcp.f32 %v289_v11  ;;  %vm297_vm12 = vmor %vm295_vm11, %vm296_vm10  ;;  %v316_v27 = vand.u32 2147483648, %v289_v11  ;;  %v314_v29 = vand.u32 2147483647, %v289_v11  ;;  %vm310_vm15 = vweird.f32 %v289_v11 }
 0x321   :  { %v292_v12 = vsub.f32 1.0, %v291_v9 }
 0x322   :  { %v317_v33 = vor.u32 1.1754944e-38, %v316_v27  ;;  %vm315_vm2 = vcmp.eq.f32.partialorder %v314_v29, 8.507059e+37 }
 0x323   :  { %v293_v16 = vmul.f32 %v1175_v8, %v292_v12 }
 0x325   :  { %v294_v13 = vadd.f32 %v1175_v8, %v293_v16 }
 0x326   :  { %v1177_v19 = vpop.eup %1176 }
 0x327   :  { %v306_v18 = vmul.f32 %v1177_v19, %v289_v11  ;;  %v298_v22 = vsel %vm297_vm12, %v1175_v8, %v294_v13  ;;  %vm311_vm14 = vweird.f32 %v1177_v19 }
 0x328   :  { %v303_v23 = vsel %vm300_vm13, %v302_v21, %v298_v22  ;;  %vm312_vm1 = vmor %vm310_vm15, %vm311_vm14  ;;  %v1127_v22 = vld [vmem:[%s1932_s6 + $0x28] sm:$0xff] }
 0x329   :  { %v307_v24 = vsub.f32 1.0, %v306_v18  ;;  %v304_v25 = vmul.f32 %v1171_v54, %v303_v23  ;;  %v1128_v18 = vld [vmem:[%s1932_s6 + $0x30] sm:$0xff] }
 0x32b   :  { %v308_v28 = vmul.f32 %v1177_v19, %v307_v24  ;;  %1083 = vmatmul.msk.f32.vlgmr.msrb.gmra.mxu3 %vm271_vm9, %v304_v25 }
 0x32c   :  { %480 = vmatpush.msrb.mxu3 %v1116_v26 }
 0x32d   :  { %v309_v31 = vadd.f32 %v1177_v19, %v308_v28 }
 0x32e   :  { %481 = vmatpush.msrb.mxu3 %v1115_v30 }
 0x32f   :  { %v313_v34 = vsel %vm312_vm1, %v1177_v19, %v309_v31 }
 0x330   :  { %v318_v37 = vsel %vm315_vm2, %v317_v33, %v313_v34  ;;  %482 = vmatpush.msrb.mxu3 %v1114_v32 }
 0x331   :  { %v319_v38 = vmul.f32 %v1173_v59, %v318_v37 }
 0x332   :  { %483 = vmatpush.msrb.mxu3 %v1113_v36 }
 0x333   :  { %1084 = vmatmul.msk.f32.gmra.mxu3 %vm271_vm9, %v319_v38 }
 0x334   :  { %484 = vmatpush.msrb.mxu3 %v1112_v40 }
 0x336   :  { %485 = vmatpush.msrb.mxu3 %v1111_v41 }
 0x338   :  { %486 = vmatpush.msrb.mxu3 %v1110_v44 }
 0x33a   :  { %487 = vmatpush.msrb.mxu3 %v1109_v48 }
 0x33b   :  { %1096 = vmatmul.msk.f32.vlgmr.msra.gmra.mxu3 %vm52_vm0, %v1462_v15 }
 0x343   :  { %1097 = vmatmul.msk.f32.gmra.mxu3 %vm52_vm0, %v1471_v20 }
 0x34b   :  { %1118 = vmatmul.msk.f32.vlgmr.msrb.gmra.mxu3 %vm52_vm0, %v1462_v15 }
 0x353   :  { %1119 = vmatmul.msk.f32.gmra.mxu3 %vm52_vm0, %v1471_v20  ;;  %v1159_v20 = vld [vmem:[%s1931_s5 + $0x5] ss:$0 sm:$0xff] }
 0x3ae   :  { %v343_v51 = vpop.f32.mrf.mxu3 }
 0x3af   :  { %1085 = vmatmul.msk.f32.vlgmr.msrb.gmra.mxu0 %vm235_vm8, %v343_v51 }
 0x3b0   :  { %1120 = vmatpush.xpose.msk.msrb.mxu0 %vm235_vm8, %v456_v49 }
 0x3b6   :  { %v346_v52 = vpop.f32.mrf.mxu3 }
 0x3b7   :  { %1086 = vmatmul.msk.f32.gmra.mxu0 %vm235_vm8, %v346_v52  ;;  %v1160_v52 = vld [vmem:[%s1933_s7] ss:$0 sm:$0xff] }
 0x3be   :  { %v415_v53 = vpop.f32.mrf.mxu3 }
 0x3bf   :  { %1107 = vmatmul.msk.f32.vlgmr.msra.gmra.mxu0 %vm52_vm0, %v1462_v15  ;;  %v416_v63 = vadd.f32 %v1158_v61, %v415_v53 }
 0x3c6   :  { %v418_v55 = vpop.f32.mrf.mxu3 }
 0x3c7   :  { %v419_v1 = vadd.f32 %v1158_v61, %v418_v55 }
 0x3ce   :  { %v489_v57 = vpop.f32.mrf.mxu3 }
 0x3cf   :  { %v490_v58 = vadd.f32 %v1159_v20, %v489_v57 }
 0x3d6   :  { %v492_v54 = vpop.f32.mrf.mxu3 }
 0x3d7   :  { %v493_v56 = vadd.f32 %v1159_v20, %v492_v54 }
 0x3d9   :  { %598 = vmatpush.msrb.mxu1 %v493_v56 }
 0x3db   :  { %599 = vmatpush.msrb.mxu1 %v490_v58 }
 0x42c   :  { %v1599_v59 = vpop.f32.mrf.mxu0 }
 0x42d   :  { %v382_v53 = vadd.f32 %v1160_v52, %v1599_v59 }
 0x434   :  { %v1601_v60 = vpop.f32.mrf.mxu0 }
 0x435   :  { %v383_v56 = vadd.f32 %v1160_v52, %v1601_v60 }
 0x43c   :  { %v452_v15 = vpop.f32.mrf.mxu0 }
 0x43d   :  { %v453_v62 = vadd.f32 %v1157_v45, %v452_v15 }
 0x43f   :  { %1121 = vmatpush.xpose.msk.msrb.mxu0 %vm235_vm8, %v453_v62 }
 0x442   :  { %1122 = vmatmul.msk.f32.vlgmr.msrb.gmra.mxu0 %vm235_vm8, %v416_v63 }
 0x44a   :  { %1123 = vmatmul.msk.f32.gmra.mxu0 %vm235_vm8, %v419_v1 }
 0x4bf   :  { %v524_v3 = vpop.f32.mrf.mxu0 }
 0x4c0   :  { %v525_v4 = vadd.f32 %v524_v3, %v1497_v35 }
 0x4c2   :  { %v530_v5 = vsel %vm271_vm9, %v525_v4, -inf }
 0x4c3   :  { %531 = vmax.xlane.f32.xlu2 %v530_v5 }
 0x4c7   :  { %v527_v6 = vpop.f32.mrf.mxu0 }
 0x4c8   :  { %v528_v7 = vadd.f32 %v527_v6, %v1504_v39  ;;  %v1129_v39 = vld [vmem:[%s1932_s6 + $0x38] sm:$0xff]  ;;  %s1227_s6 = smov 8  }
 0x4c9   :  { %630 = vmatpush.msra.mxu2 %v1129_v39  ;;  %v703_v39 = vld [vmem:[%s1936_s10 + $0x10] sm:$0xff] }
 0x4ca   :  { %v533_v8 = vsel %vm271_vm9, %v528_v7, -inf }
 0x4cb   :  { %534 = vmax.xlane.f32.xlu0 %v533_v8  ;;  %631 = vmatpush.msra.mxu2 %v1128_v18  ;;  %v716_v8 = vld [vmem:[%s1936_s10 + $0x78] sm:$0xff] }
 0x4cc   :  { %760 = vmatpush.msra.mxu0 %v716_v8  ;;  %v704_v18 = vld [vmem:[%s1936_s10 + $0x18] sm:$0xff] }
 0x4cd   :  { %632 = vmatpush.msra.mxu2 %v1127_v22  ;;  %v701_v22 = vld [vmem:[%s1936_s10] sm:$0xff] }
 0x4cf   :  { %633 = vmatpush.msra.mxu2 %v1126_v47 }
 0x536   :  { %v532_v9 = vpop.xlane.xlu2 %531 }
 0x537   :  { %v536_v11 = vsub.f32 %v525_v4, %v532_v9  ;;  %v713_v9 = vld [vmem:[%s1936_s10 + $0x60] sm:$0xff] }
 0x539   :  { %v538_v12 = vmul.f32 1.442695, %v536_v11  ;;  %v714_v11 = vld [vmem:[%s1936_s10 + $0x68] sm:$0xff] }
 0x53a   :  { %761 = vmatpush.msra.mxu0 %v714_v11  ;;  %v962_v11 = vld [vmem:[%s1938_s12 + $0x58] sm:$0xff] }
 0x53b   :  { %1178 = vpow2.f32 %v538_v12  ;;  %v711_v12 = vld [vmem:[%s1936_s10 + $0x50] sm:$0xff] }
 0x53e   :  { %v535_v14 = vpop.xlane.xlu0 %534 }
 0x53f   :  { %v537_v16 = vsub.f32 %v528_v7, %v535_v14  ;;  %v715_v7 = vld [vmem:[%s1936_s10 + $0x70] sm:$0xff]  ;;  %v712_v14 = vld [vmem:[%s1936_s10 + $0x58] sm:$0xff] }
 0x540   :  { %737 = vmatpush.msra.mxu3 %v715_v7  ;;  %762 = vmatpush.msra.mxu0 %v712_v14 }
 0x541   :  { %v1179_v17 = vpop.eup %1178  ;;  %v540_v13 = vmul.f32 1.442695, %v537_v16  ;;  %v709_v16 = vld [vmem:[%s1936_s10 + $0x40] sm:$0xff] }
 0x542   :  { %v542_v19 = vsel %vm271_vm9, %v1179_v17, 0.0  ;;  %738 = vmatpush.msra.mxu3 %v713_v9 }
 0x543   :  { %1180 = vpow2.f32 %v540_v13  ;;  %543 = vadd.xlane.f32.xlu1 %v542_v19  ;;  %v707_v13 = vld [vmem:[%s1936_s10 + $0x30] sm:$0xff]  ;;  %v708_v19 = vld [vmem:[%s1936_s10 + $0x38] sm:$0xff] }
 0x544   :  { %739 = vmatpush.msra.mxu3 %v711_v12  ;;  %v975_v12 = vld [vmem:[%s1938_s12 + $0xc0] sm:$0xff] }
 0x546   :  { %740 = vmatpush.msra.mxu3 %v709_v16 }
 0x548   :  { %741 = vmatpush.msra.mxu3 %v707_v13 }
 0x549   :  { %v1181_v35 = vpop.eup %1180 }
 0x54a   :  { %v545_v21 = vsel %vm271_vm9, %v1181_v35, 0.0 }
 0x54b   :  { %546 = vadd.xlane.f32.xlu2 %v545_v21  ;;  %v706_v21 = vld [vmem:[%s1936_s10 + $0x28] sm:$0xff] }
 0x5b6   :  { %v544_v23 = vpop.xlane.xlu1 %543 }
 0x5b7   :  { %1182 = vrcp.f32 %v544_v23  ;;  %v559_v28 = vand.u32 2147483648, %v544_v23  ;;  %v557_v30 = vand.u32 2147483647, %v544_v23  ;;  %vm553_vm4 = vweird.f32 %v544_v23 }
 0x5b9   :  { %v560_v33 = vor.u32 1.1754944e-38, %v559_v28  ;;  %vm558_vm6 = vcmp.eq.f32.partialorder %v557_v30, 8.507059e+37 }
 0x5bd   :  { %v1183_v24 = vpop.eup %1182 }
 0x5be   :  { %v549_v25 = vmul.f32 %v1183_v24, %v544_v23  ;;  %v547_v26 = vpop.xlane.xlu2 %546  ;;  %vm554_vm3 = vweird.f32 %v1183_v24  ;;  %v702_v23 = vld [vmem:[%s1936_s10 + $0x8] sm:$0xff] }
 0x5bf   :  { %1184 = vrcp.f32 %v547_v26  ;;  %vm555_vm5 = vmor %vm553_vm4, %vm554_vm3  ;;  %v574_v41 = vand.u32 2147483648, %v547_v26  ;;  %v572_v43 = vand.u32 2147483647, %v547_v26  ;;  %vm568_vm10 = vweird.f32 %v547_v26 }
 0x5c0   :  { %v550_v27 = vsub.f32 1.0, %v549_v25 }
 0x5c1   :  { %v575_v46 = vor.u32 1.1754944e-38, %v574_v41  ;;  %vm573_vm12 = vcmp.eq.f32.partialorder %v572_v43, 8.507059e+37  ;;  %v1162_v43 = vld [vmem:[%s1935_s9] ss:$0 sm:$0xff] }
 0x5c2   :  { %v551_v29 = vmul.f32 %v1183_v24, %v550_v27 }
 0x5c4   :  { %v552_v31 = vadd.f32 %v1183_v24, %v551_v29 }
 0x5c5   :  { %v1185_v32 = vpop.eup %1184 }
 0x5c6   :  { %v564_v34 = vmul.f32 %v1185_v32, %v547_v26  ;;  %v556_v36 = vsel %vm555_vm5, %v1183_v24, %v552_v31  ;;  %vm569_vm7 = vweird.f32 %v1185_v32 }
 0x5c7   :  { %v561_v37 = vsel %vm558_vm6, %v560_v33, %v556_v36  ;;  %vm570_vm11 = vmor %vm568_vm10, %vm569_vm7 }
 0x5c8   :  { %v565_v38 = vsub.f32 1.0, %v564_v34  ;;  %v562_v40 = vmul.f32 %v1179_v17, %v561_v37  ;;  %v710_v17 = vld [vmem:[%s1936_s10 + $0x48] sm:$0xff] }
 0x5c9   :  { %763 = vmatpush.msra.mxu0 %v710_v17 }
 0x5ca   :  { %v566_v42 = vmul.f32 %v1185_v32, %v565_v38  ;;  %1124 = vmatmul.msk.f32.vlgmr.msrb.gmra.mxu1 %vm271_vm9, %v562_v40  ;;  %v1161_v40 = vld [vmem:[%s1934_s8] ss:$0 sm:$0xff] }
 0x5cb   :  { %764 = vmatpush.msra.mxu0 %v708_v19  ;;  %v961_v19 = vld [vmem:[%s1938_s12 + $0x50] sm:$0xff] }
 0x5cc   :  { %v567_v44 = vadd.f32 %v1185_v32, %v566_v42 }
 0x5cd   :  { %765 = vmatpush.msra.mxu0 %v706_v21  ;;  %v974_v21 = vld [vmem:[%s1938_s12 + $0xb8] sm:$0xff] }
 0x5ce   :  { %v571_v48 = vsel %vm570_vm11, %v1185_v32, %v567_v44 }
 0x5cf   :  { %v576_v50 = vsel %vm573_vm12, %v575_v46, %v571_v48  ;;  %766 = vmatpush.msra.mxu0 %v704_v18 }
 0x5d0   :  { %v577_v45 = vmul.f32 %v1181_v35, %v576_v50  ;;  %v705_v35 = vld [vmem:[%s1936_s10 + $0x20] sm:$0xff] }
 0x5d1   :  { %742 = vmatpush.msra.mxu3 %v705_v35  ;;  %767 = vmatpush.msra.mxu0 %v702_v23 }
 0x5d2   :  { %1125 = vmatmul.msk.f32.gmra.mxu1 %vm271_vm9, %v577_v45 }
 0x5d3   :  { %743 = vmatpush.msra.mxu3 %v703_v39 }
 0x5d5   :  { %744 = vmatpush.msra.mxu3 %v701_v22  ;;  %v960_v22 = vld [vmem:[%s1938_s12 + $0x48] sm:$0xff] }
 0x647   :  { %v601_v49 = vpop.f32.mrf.mxu1 }
 0x648   :  { %1130 = vmatmul.msk.f32.vlgmr.msra.gmra.mxu2 %vm235_vm8, %v601_v49 }
 0x64f   :  { %v604_v51 = vpop.f32.mrf.mxu1 }
 0x650   :  { %1131 = vmatmul.msk.f32.gmra.mxu2 %vm235_vm8, %v604_v51 }
 0x6cb   :  { %v635_v55 = vpop.f32.mrf.mxu2 }
 0x6cc   :  { %v641_v57 = vadd.f32 %v635_v55, %v382_v53  ;;  %v982_v53 = vld [vmem:[%s1938_s12 + $0xf8] sm:$0xff]  ;;  %v1728_v55 = vld [vmem:[%s1937_s11] sm:$0x3]  ;;  %s1225_s11 = smov [#allocation2]  }
 0x6cd   :  { %1010 = vmatpush.msrb.mxu2 %v982_v53  ;;  %v969_v53 = vld [vmem:[%s1938_s12 + $0x90] sm:$0xff]  ;;  %s1041_s2 = sshll.u32 %s1225_s11, 4  ;;  %s1042_s2 = int_to_ptr.vmem [resolvable:$true] %s1041_s2 }
 0x6ce   :  { %v1636_v20 = vadd.f32 %v641_v57, %v1306_v0  ;;  %v981_v57 = vld [vmem:[%s1938_s12 + $0xf0] sm:$0xff] }
 0x6cf   :  { %1011 = vmatpush.msrb.mxu2 %v981_v57 }
 0x6d0   :  { %v647_v54 = vsel %vm52_vm0, %v1636_v20, 0.0 }
 0x6d1   :  { %648 = vadd.xlane.f32.xlu0 %v647_v54  ;;  %v720_v54 = vperm.slane %v1728_v55, 1 }
 0x6d3   :  { %v638_v58 = vpop.f32.mrf.mxu2 }
 0x6d4   :  { %v642_v61 = vadd.f32 %v638_v58, %v383_v56  ;;  %v980_v56 = vld [vmem:[%s1938_s12 + $0xe8] sm:$0xff]  ;;  %v966_v58 = vld [vmem:[%s1938_s12 + $0x78] sm:$0xff] }
 0x6d5   :  { %1012 = vmatpush.msrb.mxu2 %v980_v56  ;;  %987 = vmatpush.msra.mxu1 %v966_v58 }
 0x6d6   :  { %v1642_v15 = vadd.f32 %v642_v61, %v1313_v2  ;;  %v979_v61 = vld [vmem:[%s1938_s12 + $0xe0] sm:$0xff] }
 0x6d7   :  { %1013 = vmatpush.msrb.mxu2 %v979_v61 }
 0x6d8   :  { %v650_v62 = vsel %vm52_vm0, %v1642_v15, 0.0 }
 0x6d9   :  { %651 = vadd.xlane.f32.xlu1 %v650_v62 }
 0x744   :  { %v649_v59 = vpop.xlane.xlu0 %648 }
 0x745   :  { %v653_v63 = vmul.f32 %v649_v59, %v1317_v10 }
 0x747   :  { %v1648_v0 = vsub.f32 %v1636_v20, %v653_v63  ;;  %v965_v63 = vld [vmem:[%s1938_s12 + $0x70] sm:$0xff] }
 0x748   :  { %988 = vmatpush.msra.mxu1 %v965_v63  ;;  %v968_v63 = vld [vmem:[%s1938_s12 + $0x88] sm:$0xff] }
 0x749   :  { %v657_v1 = vmul.f32 %v1648_v0, %v1648_v0 }
 0x74b   :  { %v659_v60 = vsel %vm52_vm0, %v657_v1, 0.0 }
 0x74c   :  { %660 = vadd.xlane.f32.xlu2 %v659_v60  ;;  %v652_v3 = vpop.xlane.xlu1 %651  ;;  %v719_v60 = vperm.slane %v1728_v55, 0 }
 0x74d   :  { %v654_v2 = vmul.f32 %v652_v3, %v1317_v10  ;;  %v964_v3 = vld [vmem:[%s1938_s12 + $0x68] sm:$0xff] }
 0x74e   :  { %989 = vmatpush.msra.mxu1 %v964_v3 }
 0x74f   :  { %v1655_v4 = vsub.f32 %v1642_v15, %v654_v2  ;;  %v977_v2 = vld [vmem:[%s1938_s12 + $0xd0] sm:$0xff] }
 0x751   :  { %v658_v5 = vmul.f32 %v1655_v4, %v1655_v4 }
 0x753   :  { %v662_v6 = vsel %vm52_vm0, %v658_v5, 0.0  ;;  %v963_v5 = vld [vmem:[%s1938_s12 + $0x60] sm:$0xff] }
 0x754   :  { %663 = vadd.xlane.f32.xlu0 %v662_v6  ;;  %v976_v6 = vld [vmem:[%s1938_s12 + $0xc8] sm:$0xff]  ;;  %990 = vmatpush.msra.mxu1 %v963_v5 }
 0x756   :  { %991 = vmatpush.msra.mxu1 %v962_v11  ;;  %v967_v11 = vld [vmem:[%s1938_s12 + $0x80] sm:$0xff] }
 0x758   :  { %992 = vmatpush.msra.mxu1 %v961_v19  ;;  %v953_v19 = vld [vmem:[%s1938_s12 + $0x10] sm:$0xff] }
 0x75a   :  { %993 = vmatpush.msra.mxu1 %v960_v22 }
 0x7bf   :  { %v661_v24 = vpop.xlane.xlu2 %660 }
 0x7c0   :  { %v665_v25 = vmul.f32 %v661_v24, %v1317_v10 }
 0x7c2   :  { %v667_v26 = vadd.f32 1e-05, %v665_v25  ;;  %v973_v25 = vld [vmem:[%s1938_s12 + $0xb0] sm:$0xff] }
 0x7c4   :  { %1186 = vrsqrt.f32 %v667_v26  ;;  %vm675_vm9 = vweird.f32 %v667_v26 }
 0x7c7   :  { %v664_v27 = vpop.xlane.xlu0 %663 }
 0x7c8   :  { %v666_v28 = vmul.f32 %v664_v27, %v1317_v10 }
 0x7ca   :  { %v1187_v29 = vpop.eup %1186  ;;  %v668_v30 = vadd.f32 1e-05, %v666_v28  ;;  %v959_v28 = vld [vmem:[%s1938_s12 + $0x40] sm:$0xff] }
 0x7cb   :  { %v670_v31 = vmul.f32 %v1187_v29, %v667_v26  ;;  %vm676_vm8 = vweird.f32 %v1187_v29  ;;  %994 = vmatpush.msra.mxu1 %v959_v28 }
 0x7cc   :  { %1188 = vrsqrt.f32 %v668_v30  ;;  %vm677_vm13 = vmor %vm675_vm9, %vm676_vm8  ;;  %vm685_vm15 = vweird.f32 %v668_v30 }
 0x7cd   :  { %v671_v32 = vmul.f32 %v1187_v29, %v670_v31 }
 0x7cf   :  { %v672_v33 = vmul.f32 0.5, %v671_v32 }
 0x7d1   :  { %v673_v34 = vsub.f32 1.5, %v672_v33 }
 0x7d2   :  { %v1189_v36 = vpop.eup %1188 }
 0x7d3   :  { %v674_v37 = vmul.f32 %v1187_v29, %v673_v34  ;;  %v680_v38 = vmul.f32 %v1189_v36, %v668_v30  ;;  %vm686_vm14 = vweird.f32 %v1189_v36 }
 0x7d4   :  { %vm687_vm1 = vmor %vm685_vm15, %vm686_vm14 }
 0x7d5   :  { %v678_v41 = vsel %vm677_vm13, %v1187_v29, %v674_v37  ;;  %v681_v42 = vmul.f32 %v1189_v36, %v680_v38  ;;  %v972_v29 = vld [vmem:[%s1938_s12 + $0xa8] sm:$0xff]  ;;  %v958_v37 = vld [vmem:[%s1938_s12 + $0x38] sm:$0xff]  ;;  %v971_v38 = vld [vmem:[%s1938_s12 + $0xa0] sm:$0xff] }
 0x7d6   :  { %v689_v10 = vmul.f32 %v678_v41, %v1648_v0  ;;  %v978_v0 = vld [vmem:[%s1938_s12 + $0xd8] sm:$0xff]  ;;  %995 = vmatpush.msra.mxu1 %v958_v37 }
 0x7d7   :  { %v682_v44 = vmul.f32 0.5, %v681_v42  ;;  %1014 = vmatpush.msrb.mxu2 %v978_v0 }
 0x7d8   :  { %v694_v46 = vmul.f32 %v1161_v40, %v689_v10 }
 0x7d9   :  { %v683_v48 = vsub.f32 1.5, %v682_v44  ;;  %1015 = vmatpush.msrb.mxu2 %v977_v2 }
 0x7da   :  { %v699_v50 = vadd.f32 %v1162_v43, %v694_v46  ;;  %v957_v46 = vld [vmem:[%s1938_s12 + $0x30] sm:$0xff] }
 0x7db   :  { %v684_v45 = vmul.f32 %v1189_v36, %v683_v48  ;;  %1016 = vmatpush.msrb.mxu2 %v976_v6  ;;  %v970_v48 = vld [vmem:[%s1938_s12 + $0x98] sm:$0xff]  ;;  %996 = vmatpush.msra.mxu1 %v957_v46 }
 0x7dc   :  { %1132 = vmatmul.msk.f32.vlgmr.msra.gmra.mxu3 %vm52_vm0, %v699_v50  ;;  %1134 = vmatmul.msk.f32.vlgmr.msra.gmra.mxu0 %vm52_vm0, %v699_v50 }
 0x7dd   :  { %v688_v47 = vsel %vm687_vm1, %v1189_v36, %v684_v45  ;;  %1017 = vmatpush.msrb.mxu2 %v975_v12 }
 0x7de   :  { %v690_v49 = vmul.f32 %v688_v47, %v1655_v4 }
 0x7df   :  { %1018 = vmatpush.msrb.mxu2 %v974_v21 }
 0x7e0   :  { %v695_v51 = vmul.f32 %v1161_v40, %v690_v49 }
 0x7e1   :  { %1019 = vmatpush.msrb.mxu2 %v973_v25  ;;  %v952_v25 = vld [vmem:[%s1938_s12 + $0x8] sm:$0xff] }
 0x7e2   :  { %v700_v52 = vadd.f32 %v1162_v43, %v695_v51 }
 0x7e3   :  { %1020 = vmatpush.msrb.mxu2 %v972_v29 }
 0x7e4   :  { %1133 = vmatmul.msk.f32.gmra.mxu3 %vm52_vm0, %v700_v52  ;;  %1135 = vmatmul.msk.f32.gmra.mxu0 %vm52_vm0, %v700_v52  ;;  %v956_v52 = vld [vmem:[%s1938_s12 + $0x28] sm:$0xff] }
 0x7e5   :  { %1021 = vmatpush.msrb.mxu2 %v971_v38  ;;  %997 = vmatpush.msra.mxu1 %v956_v52 }
 0x7e7   :  { %1022 = vmatpush.msrb.mxu2 %v970_v48 }
 0x7e9   :  { %1023 = vmatpush.msrb.mxu2 %v969_v53 }
 0x7eb   :  { %1024 = vmatpush.msrb.mxu2 %v968_v63 }
 0x7ed   :  { %1025 = vmatpush.msrb.mxu2 %v967_v11 }
 0x859   :  { %v769_v62 = vpop.f32.mrf.mxu0 }
 0x85a   :  { %v1743_v59 = vadd.f32 %v769_v62, %v720_v54  ;;  %v955_v62 = vld [vmem:[%s1938_s12 + $0x20] sm:$0xff] }
 0x85b   :  { %998 = vmatpush.msra.mxu1 %v955_v62 }
 0x85c   :  { %v1752_v1 = vmul.f32 0.70710677, %v1743_v59 }
 0x85e   :  { %v823_v4 = vmul.f32 %v1752_v1, %v1752_v1 }
 0x85f   :  { %v746_v7 = vpop.f32.mrf.mxu3 }
 0x860   :  { %v1769_v8 = vmin.f32 %v823_v4, 16.0  ;;  %v1771_v9 = vadd.f32 %v746_v7, %v719_v60  ;;  %v954_v7 = vld [vmem:[%s1938_s12 + $0x18] sm:$0xff] }
 0x861   :  { %v772_v14 = vpop.f32.mrf.mxu0  ;;  %999 = vmatpush.msra.mxu1 %v954_v7 }
 0x862   :  { %v825_v16 = vmul.f32 2.1237322e-06, %v1769_v8  ;;  %v836_v17 = vmul.f32 3.8918573e-05, %v1769_v8  ;;  %v1781_v13 = vadd.f32 %v772_v14, %v720_v54  ;;  %v1787_v35 = vmul.f32 0.70710677, %v1771_v9 }
 0x863   :  { %1000 = vmatpush.msra.mxu1 %v953_v19 }
 0x864   :  { %v826_v39 = vadd.f32 0.00028619796, %v825_v16  ;;  %v837_v18 = vadd.f32 0.001143296, %v836_v17  ;;  %v783_v23 = vmul.f32 %v1787_v35, %v1787_v35  ;;  %v1798_v24 = vmul.f32 0.70710677, %v1781_v13 }
 0x865   :  { %1001 = vmatpush.msra.mxu1 %v952_v25 }
 0x866   :  { %v827_v26 = vmul.f32 %v826_v39, %v1769_v8  ;;  %v838_v27 = vmul.f32 %v837_v18, %v1769_v8  ;;  %v1811_v30 = vmin.f32 %v783_v23, 16.0  ;;  %v903_v31 = vmul.f32 %v1798_v24, %v1798_v24 }
 0x867   :  { %v749_v32 = vpop.f32.mrf.mxu3 }
 0x868   :  { %v828_v33 = vadd.f32 0.0036580483, %v827_v26  ;;  %v839_v34 = vadd.f32 0.014752088, %v838_v27  ;;  %v1815_v36 = vadd.f32 %v749_v32, %v719_v60  ;;  %v785_v40 = vmul.f32 2.1237322e-06, %v1811_v30 }
 0x869   :  { %v796_v41 = vmul.f32 3.8918573e-05, %v1811_v30  ;;  %v1825_v42 = vmin.f32 %v903_v31, 16.0  ;;  %v951_v27 = vld [vmem:[%s1938_s12] sm:$0xff] }
 0x86a   :  { %v829_v10 = vmul.f32 %v828_v33, %v1769_v8  ;;  %v840_v43 = vmul.f32 %v839_v34, %v1769_v8  ;;  %v1830_v44 = vmul.f32 0.70710677, %v1815_v36  ;;  %v786_v50 = vadd.f32 0.00028619796, %v785_v40  ;;  %1002 = vmatpush.msra.mxu1 %v951_v27 }
 0x86b   :  { %v797_v45 = vadd.f32 0.001143296, %v796_v41  ;;  %v905_v47 = vmul.f32 2.1237322e-06, %v1825_v42  ;;  %v916_v56 = vmul.f32 3.8918573e-05, %v1825_v42 }
 0x86c   :  { %v841_v49 = vadd.f32 0.112945676, %v840_v43  ;;  %v863_v51 = vmul.f32 %v1830_v44, %v1830_v44  ;;  %v787_v55 = vmul.f32 %v786_v50, %v1811_v30  ;;  %v830_v58 = vadd.f32 0.05243302, %v829_v10 }
 0x86d   :  { %v798_v57 = vmul.f32 %v797_v45, %v1811_v30  ;;  %v906_v54 = vadd.f32 0.00028619796, %v905_v47  ;;  %v917_v2 = vadd.f32 0.001143296, %v916_v56 }
 0x86e   :  { %v842_v61 = vmul.f32 %v841_v49, %v1769_v8  ;;  %v788_v0 = vadd.f32 0.0036580483, %v787_v55  ;;  %v1858_v5 = vmin.f32 %v863_v51, 16.0  ;;  %v831_v14 = vmul.f32 %v830_v58, %v1769_v8 }
 0x86f   :  { %v799_v60 = vadd.f32 0.014752088, %v798_v57  ;;  %v907_v3 = vmul.f32 %v906_v54, %v1825_v42  ;;  %v918_v12 = vmul.f32 %v917_v2, %v1825_v42 }
 0x870   :  { %v843_v4 = vadd.f32 0.4994258, %v842_v61  ;;  %v789_v17 = vmul.f32 %v788_v0, %v1811_v30  ;;  %v865_v23 = vmul.f32 2.1237322e-06, %v1858_v5  ;;  %v832_v29 = vadd.f32 0.18741608, %v831_v14 }
 0x871   :  { %v800_v6 = vmul.f32 %v799_v60, %v1811_v30  ;;  %v908_v39 = vadd.f32 0.0036580483, %v907_v3  ;;  %v919_v18 = vadd.f32 0.014752088, %v918_v12  ;;  %v876_v32 = vmul.f32 3.8918573e-05, %v1858_v5 }
 0x872   :  { %v844_v16 = vmul.f32 %v843_v4, %v1769_v8  ;;  %v790_v31 = vadd.f32 0.05243302, %v789_v17  ;;  %v866_v37 = vadd.f32 0.00028619796, %v865_v23  ;;  %v833_v41 = vmul.f32 %v832_v29, %v1769_v8 }
 0x873   :  { %v801_v21 = vadd.f32 0.112945676, %v800_v6  ;;  %v920_v28 = vmul.f32 %v919_v18, %v1825_v42  ;;  %v909_v34 = vmul.f32 %v908_v39, %v1825_v42  ;;  %v877_v46 = vadd.f32 0.001143296, %v876_v32 }
 0x874   :  { %v845_v22 = vadd.f32 1.0, %v844_v16  ;;  %v791_v10 = vmul.f32 %v790_v31, %v1811_v30  ;;  %v867_v47 = vmul.f32 %v866_v37, %v1858_v5  ;;  %v834_v53 = vadd.f32 1.1283791, %v833_v41 }
 0x875   :  { %v802_v26 = vmul.f32 %v801_v21, %v1811_v30  ;;  %v921_v38 = vadd.f32 0.112945676, %v920_v28  ;;  %v910_v50 = vadd.f32 0.05243302, %v909_v34  ;;  %v878_v51 = vmul.f32 %v877_v46, %v1858_v5 }
 0x876   :  { %1190 = vrcp.f32 %v845_v22  ;;  %v792_v55 = vadd.f32 0.18741608, %v791_v10  ;;  %v855_v58 = vand.u32 2147483647, %v845_v22  ;;  %v857_v61 = vand.u32 2147483648, %v845_v22 }
 0x877   :  { %v803_v33 = vadd.f32 0.4994258, %v802_v26  ;;  %v922_v43 = vmul.f32 %v921_v38, %v1825_v42  ;;  %v911_v8 = vmul.f32 %v910_v50, %v1825_v42  ;;  %v879_v56 = vadd.f32 0.014752088, %v878_v51 }
 0x878   :  { %v868_v62 = vadd.f32 0.0036580483, %v867_v47  ;;  %v793_v3 = vmul.f32 %v792_v55, %v1811_v30  ;;  %vm851_vm3 = vweird.f32 %v845_v22  ;;  %v858_v7 = vor.u32 1.1754944e-38, %v857_v61 }
 0x879   :  { %v804_v40 = vmul.f32 %v803_v33, %v1811_v30  ;;  %v923_v49 = vadd.f32 0.4994258, %v922_v43  ;;  %v880_v60 = vmul.f32 %v879_v56, %v1858_v5  ;;  %v912_v6 = vadd.f32 0.18741608, %v911_v8 }
 0x87a   :  { %v869_v12 = vmul.f32 %v868_v62, %v1858_v5  ;;  %v835_v14 = vmul.f32 %v834_v53, %v1752_v1  ;;  %vm856_vm5 = vcmp.eq.f32.partialorder %v855_v58, 8.507059e+37  ;;  %v794_v21 = vadd.f32 1.1283791, %v793_v3 }
 0x87b   :  { %v805_v48 = vadd.f32 1.0, %v804_v40  ;;  %v924_v54 = vmul.f32 %v923_v49, %v1825_v42  ;;  %v881_v17 = vadd.f32 0.112945676, %v880_v60  ;;  %v776_v29 = vmul.f32 0.5, %v1743_v59 }
 0x87c   :  { %v1191_v45 = vpop.eup %1190  ;;  %v870_v27 = vadd.f32 0.05243302, %v869_v12  ;;  %v795_v32 = vmul.f32 %v794_v21, %v1787_v35  ;;  %v777_v21 = vmul.f32 0.5, %v1815_v36 }
 0x87d   :  { %v847_v52 = vmul.f32 %v1191_v45, %v845_v22  ;;  %1192 = vrcp.f32 %v805_v48  ;;  %vm852_vm2 = vweird.f32 %v1191_v45  ;;  %v1893_v0 = vadd.f32 1.0, %v924_v54 }
 0x87e   :  { %vm853_vm4 = vmor %vm851_vm3, %vm852_vm2  ;;  %v817_v18 = vand.u32 2147483648, %v805_v48  ;;  %v913_v22 = vmul.f32 %v912_v6, %v1825_v42  ;;  %v882_v23 = vmul.f32 %v881_v17, %v1858_v5  ;;  %v815_v26 = vand.u32 2147483647, %v805_v48 }
 0x87f   :  { %v848_v57 = vsub.f32 1.0, %v847_v52  ;;  %1194 = vrcp.f32 %v1893_v0  ;;  %vm811_vm7 = vweird.f32 %v805_v48  ;;  %v871_v10 = vmul.f32 %v870_v27, %v1858_v5 }
 0x880   :  { %v883_v31 = vadd.f32 0.4994258, %v882_v23  ;;  %v818_v42 = vor.u32 1.1754944e-38, %v817_v18  ;;  %v914_v38 = vadd.f32 1.1283791, %v913_v22  ;;  %vm816_vm11 = vcmp.eq.f32.partialorder %v815_v26, 8.507059e+37 }
 0x881   :  { %v849_v63 = vmul.f32 %v1191_v45, %v848_v57  ;;  %v937_v50 = vand.u32 2147483648, %v1893_v0  ;;  %v935_v47 = vand.u32 2147483647, %v1893_v0  ;;  %vm931_vm8 = vweird.f32 %v1893_v0  ;;  %v1163_v18 = vld [vmem:[%s1939_s13] ss:$0 sm:$0xff]  ;;  %s1226_s13 = smov 128  }
 0x882   :  { %v884_v40 = vmul.f32 %v883_v31, %v1858_v5  ;;  %v775_v52 = vmul.f32 0.5, %v1771_v9  ;;  %v872_v53 = vadd.f32 0.18741608, %v871_v10  ;;  %v915_v8 = vmul.f32 %v914_v38, %v1798_v24 }
 0x883   :  { %v1193_v2 = vpop.eup %1192  ;;  %v850_v4 = vadd.f32 %v1191_v45, %v849_v63  ;;  %v938_v55 = vor.u32 1.1754944e-38, %v937_v50  ;;  %vm936_vm13 = vcmp.eq.f32.partialorder %v935_v47, 8.507059e+37 }
 0x884   :  { %v807_v11 = vmul.f32 %v1193_v2, %v805_v48  ;;  %vm812_vm6 = vweird.f32 %v1193_v2  ;;  %v885_v35 = vadd.f32 1.0, %v884_v40  ;;  %v873_v63 = vmul.f32 %v872_v53, %v1858_v5 }
 0x885   :  { %v854_v16 = vsel %vm853_vm4, %v1191_v45, %v850_v4  ;;  %v1195_v28 = vpop.eup %1194  ;;  %vm813_vm10 = vmor %vm811_vm7, %vm812_vm6 }
 0x886   :  { %v859_v19 = vsel %vm856_vm5, %v858_v7, %v854_v16  ;;  %v808_v39 = vsub.f32 1.0, %v807_v11  ;;  %v927_v34 = vmul.f32 %v1195_v28, %v1893_v0  ;;  %vm932_vm12 = vweird.f32 %v1195_v28 }
 0x887   :  { %v860_v30 = vmul.f32 %v859_v19, %v835_v14  ;;  %1196 = vrcp.f32 %v885_v35  ;;  %vm933_vm9 = vmor %vm931_vm8, %vm932_vm12  ;;  %v778_v0 = vmul.f32 0.5, %v1781_v13  ;;  %v874_v4 = vadd.f32 1.1283791, %v873_v63 }
 0x888   :  { %v809_v25 = vmul.f32 %v1193_v2, %v808_v39  ;;  %v928_v43 = vsub.f32 1.0, %v927_v34  ;;  %v897_v6 = vand.u32 2147483648, %v885_v35  ;;  %v895_v24 = vand.u32 2147483647, %v885_v35 }
 0x889   :  { %v1137_v1 = vclamps-f32 %v860_v30, 1.0  ;;  %vm891_vm15 = vweird.f32 %v885_v35  ;;  %v875_v5 = vmul.f32 %v874_v4, %v1830_v44 }
 0x88a   :  { %v810_v33 = vadd.f32 %v1193_v2, %v809_v25  ;;  %v929_v48 = vmul.f32 %v1195_v28, %v928_v43  ;;  %v898_v14 = vor.u32 1.1754944e-38, %v897_v6  ;;  %vm896_vm2 = vcmp.eq.f32.partialorder %v895_v24, 8.507059e+37 }
 0x88b   :  { %v944_v37 = vadd.f32 1.0, %v1137_v1 }
 0x88c   :  { %v814_v41 = vsel %vm813_vm10, %v1193_v2, %v810_v33  ;;  %v930_v51 = vadd.f32 %v1195_v28, %v929_v48 }
 0x88d   :  { %v948_v59 = vmul.f32 %v944_v37, %v776_v29  ;;  %v819_v46 = vsel %vm816_vm11, %v818_v42, %v814_v41  ;;  %v1197_v62 = vpop.eup %1196 }
 0x88e   :  { %v820_v45 = vmul.f32 %v819_v46, %v795_v32  ;;  %v934_v54 = vsel %vm933_vm9, %v1195_v28, %v930_v51  ;;  %v887_v3 = vmul.f32 %v1197_v62, %v885_v35  ;;  %vm892_vm14 = vweird.f32 %v1197_v62 }
 0x88f   :  { %1026 = vmatmul.f32.vlgmr.msrb.gmra.mxu2 %v948_v59  ;;  %v939_v56 = vsel %vm936_vm13, %v938_v55, %v934_v54  ;;  %vm893_vm1 = vmor %vm891_vm15, %vm892_vm14 }
 0x890   :  { %v1136_v49 = vclamps-f32 %v820_v45, 1.0  ;;  %v940_v61 = vmul.f32 %v939_v56, %v915_v8  ;;  %v888_v2 = vsub.f32 1.0, %v887_v3 }
 0x892   :  { %v943_v57 = vadd.f32 1.0, %v1136_v49  ;;  %v1139_v60 = vclamps-f32 %v940_v61, 1.0  ;;  %v889_v11 = vmul.f32 %v1197_v62, %v888_v2 }
 0x894   :  { %v947_v58 = vmul.f32 %v943_v57, %v775_v52  ;;  %v946_v9 = vadd.f32 1.0, %v1139_v60  ;;  %v890_v12 = vadd.f32 %v1197_v62, %v889_v11 }
 0x896   :  { %1003 = vmatmul.f32.vlgmr.msra.gmra.mxu1 %v947_v58  ;;  %v950_v7 = vmul.f32 %v946_v9, %v778_v0  ;;  %v894_v16 = vsel %vm893_vm1, %v1197_v62, %v890_v12 }
 0x897   :  { %v899_v17 = vsel %vm896_vm2, %v898_v14, %v894_v16 }
 0x898   :  { %1029 = vmatmul.f32.gmra.mxu2 %v950_v7  ;;  %v900_v19 = vmul.f32 %v899_v17, %v875_v5 }
 0x89a   :  { %v1138_v13 = vclamps-f32 %v900_v19, 1.0 }
 0x89c   :  { %v945_v39 = vadd.f32 1.0, %v1138_v13 }
 0x89e   :  { %v949_v30 = vmul.f32 %v945_v39, %v777_v21 }
 0x8a0   :  { %1006 = vmatmul.f32.gmra.mxu1 %v949_v30 }
 0x912   :  { %v1027_v25 = vpop.f32.mrf.mxu2 }
 0x913   :  { %v1004_v22 = vpop.f32.mrf.mxu1 }
 0x914   :  { %v1005_v23 = vadd.f32 %v1163_v18, %v1004_v22 }
 0x916   :  { %v1028_v26 = vadd.f32 %v1027_v25, %v1005_v23 }
 0x918   :  { %v1033_v44 = vadd.f32 %v1028_v26, %v1636_v20 }
 0x91a   :  { %1035 = vst.msk [vmem:[#allocation2] sm:$0xff] %vm52_vm0, %v1033_v44 }
 0x91b   :  { %v1030_v36 = vpop.f32.mrf.mxu2 }
 0x91d   :  { %v1007_v27 = vpop.f32.mrf.mxu1 }
 0x91e   :  { %v1008_v28 = vadd.f32 %v1163_v18, %v1007_v27 }
 0x920   :  { %v1031_v29 = vadd.f32 %v1030_v36, %v1008_v28 }
 0x922   :  { %v1034_v1 = vadd.f32 %v1031_v29, %v1642_v15 }
 0x924   :  { %1036 = vst.msk [vmem:[#allocation2 + $0x8] sm:$0xff] %vm52_vm0, %v1034_v1 }
 0x925   :  { %1049 = dma.vmem_to_hbm [thread:$0]  %s1042_s2, 256, %s1044_s17, [#allocation3], %s1226_s13, %s1226_s13, %s1227_s6  }
 0x926   :  { %1222 = dma.done.wait [#allocation3], 256  }
 0x927   :  { %1223 = vsyncadd [#allocation3], 4294967040 }
 0x928   :  { %1054 = vsyncpa [#allocation3], 1 }

</bundles_post_ra>
